<compile_context>
chip_gen: v7x
topology: tpu7x:2x2x1
jax: 0.10.0
libtpu: 0.0.40
codegen_flags: <defaults>
</compile_context>

<pallas_src>
import functools

import jax
import jax.numpy as jnp
from jax.experimental import pallas as pl
from jax.experimental.pallas import tpu as pltpu


def _round_up(x, m):
    return ((x + m - 1) // m) * m


def _cdiv(a, b):
    return -(-a // b)


def _vmem_capacity_bytes():
    """Physical VMEM of the local TPU generation (fallback: v7x's 64 MiB)."""
    try:
        cap = getattr(pltpu.get_tpu_info(), "vmem_capacity_bytes", None)
        if cap:
            return int(cap)
    except Exception:
        pass
    return 64 * 1024 * 1024


def _bibayes_conv_kernel(xt_ref, wd_ref, out_ref, lhs_ref, *,
                         K, C, dilation, Wp, blk):
    """One (group, batch, row-tile) step of the fused binary-concrete conv.

    xt_ref : (1, 1, 1, blk + halo_pad, C)   input slab (tile rows + halo)
    wd_ref : (1, K*K*C, N)                  relaxed weights (VMEM-resident)
    out_ref: (1, 1, 1, blk, N)              output tile (exactly N lanes)
    lhs_ref: (blk, K*K*C)                   fused im2col LHS scratch (VMEM)
    """
    # Build the im2col LHS from K*K statically-shifted (blk, C) slices of the
    # slab; these are plain sub-tile VMEM copies (no HBM im2col expansion).
    for kh in range(K):
        for kw in range(K):
            tap = kh * K + kw
            off = dilation * (kh * Wp + kw)
            lhs_ref[:, tap * C:(tap + 1) * C] = xt_ref[0, 0, 0, off:off + blk, :]
    # One MXU matmul with contraction K*K*C (vs K*K dots of contraction C).
    acc = jax.lax.dot_general(
        lhs_ref[...], wd_ref[0], (((1,), (0,)), ((), ())),
        preferred_element_type=jnp.float32)
    out_ref[0, 0, 0] = acc.astype(out_ref.dtype)


def bibayesian_conv_forward(x, weight, key, *, n_samples=1, tau=1.0,
                            stride=1, padding=0, dilation=1,
                            block_ho=None, compute_dtype=None):
    """Exact equivalent of BiBayesianConv.forward.

    x: (B, C, H, W) or (n_samples, B, C, H, W); weight: (O, C, K, K).
    Returns (n_samples, B, O, Ho, Wo) with the module's literal .view semantics.
    """
    O, C, K, _ = weight.shape
    S = n_samples
    out_dtype = x.dtype
    cdt = jnp.dtype(compute_dtype) if compute_dtype is not None else jnp.dtype(x.dtype)

    # Binary-concrete relaxation, hoisted out of the kernel (tiny tensor).
    # epsilon ~ Uniform(1e-10, 1); delta = 0.5 * log(eps / (1 - eps)).
    eps = jax.random.uniform(key, (S,) + weight.shape, dtype=weight.dtype,
                             minval=1e-10, maxval=1.0)
    delta = 0.5 * jnp.log(eps / (1.0 - eps))
    w_rel = jnp.tanh((weight[None] + delta) / tau)               # (S, O, C, K, K)

    if x.ndim == 4:
        x = x[None]                                              # torch .unsqueeze(0)
    S_in, B, _, H, W = x.shape
    shared = (S_in == 1)                                         # torch .repeat path

    if shared:
        # De-dup: read the activations once; fold every sample's relaxed
        # weights into the matmul N dimension (columns ordered s*O + o).
        xg = x[0].transpose(0, 2, 3, 1)[None]                            # (1,B,H,W,C)
        wd = w_rel.transpose(3, 4, 2, 0, 1).reshape(1, K * K * C, S * O)
        G, N = 1, S * O
    else:
        if S_in != S:
            raise ValueError("5-D input leading dim must be 1 or n_samples")
        # torch's raw .view(B, S*C, H, W): group s of batch b reads this slab.
        xg = x.reshape(B, S, C, H, W).transpose(1, 0, 3, 4, 2)           # (S,B,H,W,C)
        wd = w_rel.transpose(0, 3, 4, 2, 1).reshape(S, K * K * C, O)
        G, N = S, O

    xg = xg.astype(cdt)
    wd = wd.astype(cdt)

    Hp, Wp = H + 2 * padding, W + 2 * padding
    HoF = Hp - dilation * (K - 1)                    # stride-1 output height
    WoF = Wp - dilation * (K - 1)
    if HoF <= 0 or WoF <= 0:
        raise ValueError("kernel does not fit inside the (padded) input")
    Ho = (HoF - 1) // stride + 1
    Wo = (WoF - 1) // stride + 1
    KKC = K * K * C

    # ---- generation-aware, VMEM-budget-driven row tiling --------------------
    vmem_cap = _vmem_capacity_bytes()
    in_item = jnp.dtype(cdt).itemsize
    out_item = jnp.dtype(out_dtype).itemsize
    lanes = lambda n: _round_up(max(int(n), 1), 128)             # VMEM lane padding
    # Per flattened spatial row: double-buffered input + output blocks, the
    # im2col LHS scratch, the f32 matmul result, and slice temporaries.
    per_row = (2 * lanes(C) * in_item + 2 * lanes(N) * out_item
               + lanes(KKC) * in_item + lanes(N) * 4 + 2 * lanes(C) * in_item)
    if block_ho is None:
        by_vmem = (vmem_cap // 2) // (per_row * Wp)
        by_codesize = 4096 // Wp              # bound the per-step unrolled code
        block_ho = max(8, (min(by_vmem, by_codesize) // 8) * 8)
    else:
        block_ho = max(8, (int(block_ho) // 8) * 8)
    block_ho = min(block_ho, max(8, _round_up(HoF, 8)))

    n_th = _cdiv(HoF, block_ho)
    HoP = n_th * block_ho
    blk = block_ho * Wp                       # flattened (H*W) rows per tile
    halo = dilation * (K - 1) * (Wp + 1)      # extra rows read beyond the tile
    halo_pad = _round_up(halo, 8)
    total_rows = n_th * blk + halo_pad
    Hx = max(Hp, _cdiv(total_rows, Wp))       # only halo rows of extra padding

    xg = jnp.pad(xg, ((0, 0), (0, 0),
                      (padding, Hx - H - padding),
                      (padding, padding),
                      (0, 0)))
    xg = xg.reshape(G, B, Hx * Wp, C)         # channels-last, flattened H*W
    # Per-tile slabs with the halo baked in: one input DMA per grid step, no
    # in-kernel concatenate (the duplication is only halo_pad/blk, i.e. tiny).
    xt = jnp.stack([xg[:, :, i * blk:i * blk + blk + halo_pad, :]
                    for i in range(n_th)], axis=2)     # (G, B, n_th, blk+halo, C)

    kernel = functools.partial(_bibayes_conv_kernel, K=K, C=C,
                               dilation=dilation, Wp=Wp, blk=blk)

    vmem_limit = int(min(vmem_cap,
                         max(32 * 1024 * 1024,
                             min(int(0.8 * vmem_cap), vmem_cap - (2 << 20)))))

    y = pl.pallas_call(
        kernel,
        out_shape=jax.ShapeDtypeStruct((G, B, n_th, blk, N), out_dtype),
        grid=(G, B, n_th),
        in_specs=[
            pl.BlockSpec((1, 1, 1, blk + halo_pad, C),
                         lambda g, b, i: (g, b, i, 0, 0)),            # input slab
            pl.BlockSpec((1, KKC, N), lambda g, b, i: (g, 0, 0)),     # weights
        ],
        out_specs=pl.BlockSpec((1, 1, 1, blk, N),
                               lambda g, b, i: (g, b, i, 0, 0)),
        scratch_shapes=[pltpu.VMEM((blk, KKC), cdt)],
        compiler_params=pltpu.CompilerParams(
            dimension_semantics=("parallel", "parallel", "parallel"),
            vmem_limit_bytes=vmem_limit),
    )(xt, wd)

    # Un-flatten, drop padded rows/cols, apply the conv stride by subsampling.
    y = y.reshape(G, B, HoP, Wp, N)[:, :, :HoF:stride, :WoF:stride, :]

    if shared:
        # y[0, b, ho, wo, s*O + o] = conv(x[b], w_rel[s]).  Rebuild the grouped
        # conv output exactly as torch's F.conv2d on the raw .view(B,S*C,H,W):
        #   out_c[b, s*O + o] = conv(x[(b*S + s) % B], w_rel[s]).
        yc = y[0].reshape(B, Ho, Wo, S, O).transpose(3, 0, 4, 1, 2)   # (S,B,O,Ho,Wo)
        b_src = (jnp.arange(B)[:, None] * S + jnp.arange(S)[None, :]) % B
        out_c = yc[jnp.arange(S)[None, :], b_src]                     # (B,S,O,Ho,Wo)
        conv_out = out_c.reshape(B, S * O, Ho, Wo)
    else:
        # y[s, b, ho, wo, o] already holds out_c[b, s*O + o].
        conv_out = y.transpose(1, 0, 4, 2, 3).reshape(B, S * O, Ho, Wo)

    # Final torch `.view(n_samples, B, O, Ho, Wo)` of the contiguous NCHW output.
    return conv_out.reshape(S, B, O, Ho, Wo)


def _torch_reference(x, weight, key, *, n_samples, tau, stride, padding, dilation):
    """Literal pure-JAX translation of BiBayesianConv.forward."""
    O, C, K, _ = weight.shape
    S = n_samples
    eps = jax.random.uniform(key, (S,) + weight.shape, dtype=weight.dtype,
                             minval=1e-10, maxval=1.0)
    delta = 0.5 * jnp.log(eps / (1.0 - eps))
    w_rel = jnp.tanh((weight[None] + delta) / tau).reshape(S * O, C, K, K)
    if x.ndim == 4:
        x = x[None]
    if x.shape[0] == 1:
        x = jnp.tile(x, (S, 1, 1, 1, 1))
    B = x.shape[1]
    x_view = x.reshape(B, S * x.shape[2], x.shape[3], x.shape[4])     # raw .view
    out = jax.lax.conv_general_dilated(
        x_view, w_rel, window_strides=(stride, stride),
        padding=((padding, padding), (padding, padding)),
        rhs_dilation=(dilation, dilation),
        dimension_numbers=("NCHW", "OIHW", "NCHW"),
        feature_group_count=S, precision=jax.lax.Precision.HIGHEST)
    return out.reshape(S, B, out.shape[1] // S, out.shape[2], out.shape[3])


if __name__ == "__main__":
    key = jax.random.PRNGKey(0)
    k_x, k_w, k_n1, k_n2, k_x5 = jax.random.split(key, 5)

    # Small shapes: in_features=4, out_features=8, kernel_size=3, batch=2, 16x16.
    B, C, H, W = 2, 4, 16, 16
    O, K = 8, 3
    S = 3            # n_samples
    tau = 1.0

    x = jax.random.normal(k_x, (B, C, H, W), dtype=jnp.float32)
    # Module __init__ uses torch.zeros((O, C, K, K)); small random values are
    # used instead so the test exercises non-trivial compute.
    weight = 0.1 * jax.random.normal(k_w, (O, C, K, K), dtype=jnp.float32)

    # Case 1: 4-D input (torch .repeat path), no padding, stride 1.
    out1 = jax.block_until_ready(
        bibayesian_conv_forward(x, weight, k_n1, n_samples=S, tau=tau))
    assert out1.shape == (S, B, O, H - K + 1, W - K + 1), out1.shape
    ref1 = _torch_reference(x, weight, k_n1, n_samples=S, tau=tau,
                            stride=1, padding=0, dilation=1)
    assert jnp.allclose(out1, ref1, atol=3e-2, rtol=3e-2), \
        float(jnp.max(jnp.abs(out1 - ref1)))

    # Case 2: spatial padding + stride 2.
    out2 = jax.block_until_ready(
        bibayesian_conv_forward(x, weight, k_n1, n_samples=S, tau=tau,
                                padding=1, stride=2))
    ref2 = _torch_reference(x, weight, k_n1, n_samples=S, tau=tau,
                            stride=2, padding=1, dilation=1)
    assert out2.shape == ref2.shape == (S, B, O, 8, 8), out2.shape
    assert jnp.allclose(out2, ref2, atol=3e-2, rtol=3e-2), \
        float(jnp.max(jnp.abs(out2 - ref2)))

    # Case 3: 5-D input with distinct per-sample activations (non-shared path).
    x5 = jax.random.normal(k_x5, (S, B, C, H, W), dtype=jnp.float32)
    out3 = jax.block_until_ready(
        bibayesian_conv_forward(x5, weight, k_n2, n_samples=S, tau=tau))
    ref3 = _torch_reference(x5, weight, k_n2, n_samples=S, tau=tau,
                            stride=1, padding=0, dilation=1)
    assert out3.shape == ref3.shape == (S, B, O, H - K + 1, W - K + 1), out3.shape
    assert jnp.allclose(out3, ref3, atol=3e-2, rtol=3e-2), \
        float(jnp.max(jnp.abs(out3 - ref3)))

    # Case 4: bf16 activation/weight compute path (f32 accumulation), loose tol.
    out4 = jax.block_until_ready(
        bibayesian_conv_forward(x, weight, k_n1, n_samples=S, tau=tau,
                                compute_dtype=jnp.bfloat16))
    assert out4.dtype == jnp.float32 and out4.shape == out1.shape
    assert jnp.allclose(out4, ref1, atol=3e-1, rtol=1e-1), \
        float(jnp.max(jnp.abs(out4 - ref1)))

    print("KERNEL_OK")
</pallas_src>

<mosaic_0001>
module attributes {stable_mosaic.version = 11 : i64} {
  func.func @_bibayes_conv_kernel(%arg0: i32, %arg1: i32, %arg2: i32, %arg3: memref<1x1x1x296x4xf32, #tpu.memory_space<vmem>>, %arg4: memref<1x36x24xf32, #tpu.memory_space<vmem>>, %arg5: memref<1x1x1x256x24xf32, #tpu.memory_space<vmem>>, %arg6: memref<256x36xf32, #tpu.memory_space<vmem>>) attributes {dimension_semantics = [#tpu.dimension_semantics<parallel>, #tpu.dimension_semantics<parallel>, #tpu.dimension_semantics<parallel>], iteration_bounds = array<i64: 1, 2, 1>, scalar_prefetch = 0 : i64, scratch_operands = 1 : i64, tpu.core_type = #tpu.core_type<tc>, window_params = [{transform_indices = @transform_0, window_bounds = array<i64: 1, 1, 1, 296, 4>}, {transform_indices = @transform_1, window_bounds = array<i64: 1, 36, 24>}, {transform_indices = @transform_2, window_bounds = array<i64: 1, 1, 1, 256, 24>}]} {
    %c0 = arith.constant 0 : index
    %c0_0 = arith.constant 0 : index
    %c0_1 = arith.constant 0 : index
    %c0_2 = arith.constant 0 : index
    %c0_3 = arith.constant 0 : index
    %0 = vector.load %arg3[%c0, %c0_0, %c0_1, %c0_2, %c0_3] : memref<1x1x1x296x4xf32, #tpu.memory_space<vmem>>, vector<1x1x1x256x4xf32>
    %1 = vector.shape_cast %0 : vector<1x1x1x256x4xf32> to vector<256x4xf32>
    %c0_4 = arith.constant 0 : index
    %c0_5 = arith.constant 0 : index
    %2 = vector.load %arg6[%c0_4, %c0_5] : memref<256x36xf32, #tpu.memory_space<vmem>>, vector<256x4xf32>
    tpu.vector_store %arg6[%c0_4, %c0_5], %1 {strides = array<i32>} : memref<256x36xf32, #tpu.memory_space<vmem>>, vector<256x4xf32>,
    %c0_6 = arith.constant 0 : index
    %c0_7 = arith.constant 0 : index
    %c0_8 = arith.constant 0 : index
    %c1 = arith.constant 1 : index
    %c0_9 = arith.constant 0 : index
    %3 = vector.load %arg3[%c0_6, %c0_7, %c0_8, %c1, %c0_9] : memref<1x1x1x296x4xf32, #tpu.memory_space<vmem>>, vector<1x1x1x256x4xf32>
    %4 = vector.shape_cast %3 : vector<1x1x1x256x4xf32> to vector<256x4xf32>
    %c0_10 = arith.constant 0 : index
    %c4 = arith.constant 4 : index
    %5 = vector.load %arg6[%c0_10, %c4] : memref<256x36xf32, #tpu.memory_space<vmem>>, vector<256x4xf32>
    tpu.vector_store %arg6[%c0_10, %c4], %4 {strides = array<i32>} : memref<256x36xf32, #tpu.memory_space<vmem>>, vector<256x4xf32>,
    %c0_11 = arith.constant 0 : index
    %c0_12 = arith.constant 0 : index
    %c0_13 = arith.constant 0 : index
    %c2 = arith.constant 2 : index
    %c0_14 = arith.constant 0 : index
    %6 = vector.load %arg3[%c0_11, %c0_12, %c0_13, %c2, %c0_14] : memref<1x1x1x296x4xf32, #tpu.memory_space<vmem>>, vector<1x1x1x256x4xf32>
    %7 = vector.shape_cast %6 : vector<1x1x1x256x4xf32> to vector<256x4xf32>
    %c0_15 = arith.constant 0 : index
    %c8 = arith.constant 8 : index
    %8 = vector.load %arg6[%c0_15, %c8] : memref<256x36xf32, #tpu.memory_space<vmem>>, vector<256x4xf32>
    tpu.vector_store %arg6[%c0_15, %c8], %7 {strides = array<i32>} : memref<256x36xf32, #tpu.memory_space<vmem>>, vector<256x4xf32>,
    %c0_16 = arith.constant 0 : index
    %c0_17 = arith.constant 0 : index
    %c0_18 = arith.constant 0 : index
    %c16 = arith.constant 16 : index
    %c0_19 = arith.constant 0 : index
    %9 = vector.load %arg3[%c0_16, %c0_17, %c0_18, %c16, %c0_19] : memref<1x1x1x296x4xf32, #tpu.memory_space<vmem>>, vector<1x1x1x256x4xf32>
    %10 = vector.shape_cast %9 : vector<1x1x1x256x4xf32> to vector<256x4xf32>
    %c0_20 = arith.constant 0 : index
    %c12 = arith.constant 12 : index
    %11 = vector.load %arg6[%c0_20, %c12] : memref<256x36xf32, #tpu.memory_space<vmem>>, vector<256x4xf32>
    tpu.vector_store %arg6[%c0_20, %c12], %10 {strides = array<i32>} : memref<256x36xf32, #tpu.memory_space<vmem>>, vector<256x4xf32>,
    %c0_21 = arith.constant 0 : index
    %c0_22 = arith.constant 0 : index
    %c0_23 = arith.constant 0 : index
    %c17 = arith.constant 17 : index
    %c0_24 = arith.constant 0 : index
    %12 = vector.load %arg3[%c0_21, %c0_22, %c0_23, %c17, %c0_24] : memref<1x1x1x296x4xf32, #tpu.memory_space<vmem>>, vector<1x1x1x256x4xf32>
    %13 = vector.shape_cast %12 : vector<1x1x1x256x4xf32> to vector<256x4xf32>
    %c0_25 = arith.constant 0 : index
    %c16_26 = arith.constant 16 : index
    %14 = vector.load %arg6[%c0_25, %c16_26] : memref<256x36xf32, #tpu.memory_space<vmem>>, vector<256x4xf32>
    tpu.vector_store %arg6[%c0_25, %c16_26], %13 {strides = array<i32>} : memref<256x36xf32, #tpu.memory_space<vmem>>, vector<256x4xf32>,
    %c0_27 = arith.constant 0 : index
    %c0_28 = arith.constant 0 : index
    %c0_29 = arith.constant 0 : index
    %c18 = arith.constant 18 : index
    %c0_30 = arith.constant 0 : index
    %15 = vector.load %arg3[%c0_27, %c0_28, %c0_29, %c18, %c0_30] : memref<1x1x1x296x4xf32, #tpu.memory_space<vmem>>, vector<1x1x1x256x4xf32>
    %16 = vector.shape_cast %15 : vector<1x1x1x256x4xf32> to vector<256x4xf32>
    %c0_31 = arith.constant 0 : index
    %c20 = arith.constant 20 : index
    %17 = vector.load %arg6[%c0_31, %c20] : memref<256x36xf32, #tpu.memory_space<vmem>>, vector<256x4xf32>
    tpu.vector_store %arg6[%c0_31, %c20], %16 {strides = array<i32>} : memref<256x36xf32, #tpu.memory_space<vmem>>, vector<256x4xf32>,
    %c0_32 = arith.constant 0 : index
    %c0_33 = arith.constant 0 : index
    %c0_34 = arith.constant 0 : index
    %c32 = arith.constant 32 : index
    %c0_35 = arith.constant 0 : index
    %18 = vector.load %arg3[%c0_32, %c0_33, %c0_34, %c32, %c0_35] : memref<1x1x1x296x4xf32, #tpu.memory_space<vmem>>, vector<1x1x1x256x4xf32>
    %19 = vector.shape_cast %18 : vector<1x1x1x256x4xf32> to vector<256x4xf32>
    %c0_36 = arith.constant 0 : index
    %c24 = arith.constant 24 : index
    %20 = vector.load %arg6[%c0_36, %c24] : memref<256x36xf32, #tpu.memory_space<vmem>>, vector<256x4xf32>
    tpu.vector_store %arg6[%c0_36, %c24], %19 {strides = array<i32>} : memref<256x36xf32, #tpu.memory_space<vmem>>, vector<256x4xf32>,
    %c0_37 = arith.constant 0 : index
    %c0_38 = arith.constant 0 : index
    %c0_39 = arith.constant 0 : index
    %c33 = arith.constant 33 : index
    %c0_40 = arith.constant 0 : index
    %21 = vector.load %arg3[%c0_37, %c0_38, %c0_39, %c33, %c0_40] : memref<1x1x1x296x4xf32, #tpu.memory_space<vmem>>, vector<1x1x1x256x4xf32>
    %22 = vector.shape_cast %21 : vector<1x1x1x256x4xf32> to vector<256x4xf32>
    %c0_41 = arith.constant 0 : index
    %c28 = arith.constant 28 : index
    %23 = vector.load %arg6[%c0_41, %c28] : memref<256x36xf32, #tpu.memory_space<vmem>>, vector<256x4xf32>
    tpu.vector_store %arg6[%c0_41, %c28], %22 {strides = array<i32>} : memref<256x36xf32, #tpu.memory_space<vmem>>, vector<256x4xf32>,
    %c0_42 = arith.constant 0 : index
    %c0_43 = arith.constant 0 : index
    %c0_44 = arith.constant 0 : index
    %c34 = arith.constant 34 : index
    %c0_45 = arith.constant 0 : index
    %24 = vector.load %arg3[%c0_42, %c0_43, %c0_44, %c34, %c0_45] : memref<1x1x1x296x4xf32, #tpu.memory_space<vmem>>, vector<1x1x1x256x4xf32>
    %25 = vector.shape_cast %24 : vector<1x1x1x256x4xf32> to vector<256x4xf32>
    %c0_46 = arith.constant 0 : index
    %c32_47 = arith.constant 32 : index
    %26 = vector.load %arg6[%c0_46, %c32_47] : memref<256x36xf32, #tpu.memory_space<vmem>>, vector<256x4xf32>
    tpu.vector_store %arg6[%c0_46, %c32_47], %25 {strides = array<i32>} : memref<256x36xf32, #tpu.memory_space<vmem>>, vector<256x4xf32>,
    %c0_48 = arith.constant 0 : index
    %c0_49 = arith.constant 0 : index
    %27 = vector.load %arg6[%c0_48, %c0_49] : memref<256x36xf32, #tpu.memory_space<vmem>>, vector<256x36xf32>
    %c0_50 = arith.constant 0 : index
    %c0_51 = arith.constant 0 : index
    %c0_52 = arith.constant 0 : index
    %28 = vector.load %arg4[%c0_50, %c0_51, %c0_52] : memref<1x36x24xf32, #tpu.memory_space<vmem>>, vector<1x36x24xf32>
    %29 = vector.shape_cast %28 : vector<1x36x24xf32> to vector<36x24xf32>
    %cst = arith.constant dense<0.000000e+00> : vector<256x24xf32>
    %30 = tpu.matmul %27, %29, %cst {dimension_numbers = #tpu.dot_dimension_numbers<[1], [0], [0], [1], [0, 0, 1, 1], [], []>} : vector<256x36xf32>, vector<36x24xf32>, vector<256x24xf32> -> vector<256x24xf32>
    %c0_53 = arith.constant 0 : index
    %c0_54 = arith.constant 0 : index
    %c0_55 = arith.constant 0 : index
    %c0_56 = arith.constant 0 : index
    %c0_57 = arith.constant 0 : index
    %31 = vector.load %arg5[%c0_53, %c0_54, %c0_55, %c0_56, %c0_57] : memref<1x1x1x256x24xf32, #tpu.memory_space<vmem>>, vector<1x1x1x256x24xf32>
    %32 = vector.shape_cast %31 : vector<1x1x1x256x24xf32> to vector<256x24xf32>
    %33 = vector.shape_cast %30 : vector<256x24xf32> to vector<1x1x1x256x24xf32>
    tpu.vector_store %arg5[%c0_53, %c0_54, %c0_55, %c0_56, %c0_57], %33 {strides = array<i32>} : memref<1x1x1x256x24xf32, #tpu.memory_space<vmem>>, vector<1x1x1x256x24xf32>,
    return
  }
  func.func @transform_0(%arg0: i32, %arg1: i32, %arg2: i32) -> (i32, i32, i32, i32, i32) {
    %c0_i32 = arith.constant 0 : i32
    %c0_i32_0 = arith.constant 0 : i32
    %c0_i32_1 = arith.constant 0 : i32
    return %arg0, %arg1, %arg2, %c0_i32, %c0_i32_0 : i32, i32, i32, i32, i32
  }
  func.func @transform_1(%arg0: i32, %arg1: i32, %arg2: i32) -> (i32, i32, i32) {
    %c0_i32 = arith.constant 0 : i32
    %c0_i32_0 = arith.constant 0 : i32
    %c0_i32_1 = arith.constant 0 : i32
    return %arg0, %c0_i32, %c0_i32_0 : i32, i32, i32
  }
  func.func @transform_2(%arg0: i32, %arg1: i32, %arg2: i32) -> (i32, i32, i32, i32, i32) {
    %c0_i32 = arith.constant 0 : i32
    %c0_i32_0 = arith.constant 0 : i32
    %c0_i32_1 = arith.constant 0 : i32
    return %arg0, %arg1, %arg2, %c0_i32, %c0_i32_0 : i32, i32, i32, i32, i32
  }
}

</mosaic_0001>

<bundles_post_ra>
// kernel: tpu_custom_call.1
= control target key start
LH: loop header
LB: loop body
LE: loop exit
PB: predicated region body
PF: predicated region fallthrough
CT: control target
= control target key end

     0   :  { %s2603_s9 = smov 0   ;;  %s2605_s10 = smov 0   ;;  %s3725_s0 = inlined_call_operand.vmem [shape: f32[1,2,1,296,4], index: 0, kind: input, shape index: {}]   ;;  %s3726_s1 = inlined_call_operand.vmem [shape: f32[1,36,24], index: 1, kind: input, shape index: {}]   ;;  %s3727_s2 = inlined_call_operand.vmem [shape: f32[1,2,1,256,24], index: 2, kind: output, shape index: {}]  }
   0x1   :  { %s2607_s11 = smov 0  }
   0x2 LB: > { %s27_s12 = sadd.s32 1, %s2574_s10  ;;  %p2374_p0 = scmp.ge.s32.totalorder %s2578_s11, 1  ;;  %s2578_s11 = sphi %s2607_s11, %s12_s11   ;;  %s2574_s10 = sphi %s2605_s10, %s3743_s10   ;;  %s2570_s9 = sphi %s2603_s9, %s3742_s9  }
   0x3   : > { %p29_p1 = scmp.ge.s32.totalorder %s27_s12, 2  ;;  %p157_p2 = scmp.lt.s32.totalorder %s2578_s11, 3 }
   0x5   : > { %s3745_s12 = smov (%p29_p1, %s27_s12), 0  ;;  %p158_p3 = pnand %p2374_p0, %p157_p2 }
   0x7   : > { %161 = sbr.rel (%p158_p3) target bundleno = 867 (0x363), region = 28 }
   0xe   : > { %p202_p4 = scmp.lt.s32.totalorder %s2570_s9, 1  ;;  %s2580_s17 = smov 4   ;;  %vm263_vm0 = vcmask 31744   ;;  %vm456_vm1 = vcmask 64544   ;;  %vm649_vm2 = vcmask 97344   ;;  %vm1974_vm3 = vcmask 1043456  }
   0xf   : > { %s2581_s18 = smov 8   ;;  %s2582_s19 = smov 12   ;;  %vm842_vm4 = vcmask 130144   ;;  %vm1035_vm5 = vcmask 162944   ;;  %vm1228_vm6 = vcmask 195744   ;;  %vm1421_vm7 = vcmask 228544  }
  0x10   : > { %s3747_s9 = smov (!%p202_p4, %s2570_s9), 1  ;;  %s2583_s20 = smov 16   ;;  %vm1614_vm8 = vcmask 261344   ;;  %vm1807_vm9 = vcmask 294144   ;;  %vm1877_vm10 = vcmask 293888   ;;  %vm2203_vm11 = vcmask 195584  }
  0x11   : > { %s2523_s13 = smul.u32 296, %s3747_s9  ;;  %s2584_s21 = smov 20  }
  0x12   : > { %s2585_s22 = smov 24   ;;  %s2586_s23 = smov 28  }
  0x13   : > { %s2627_s16 = scalar_lea.vmem %s3725_s0, %s2523_s13  ;;  %s2587_s4 = smov 32  }
  0x14   : > { %v2630_v0 = vld [vmem:[%s2627_s16 + $0x11] sm:$0xff]  ;;  %v296_v1 = vld [vmem:[%s2627_s16 + $0x1] sm:$0xff]  ;;  %v2637_v2 = vld [vmem:[%s2627_s16 + $0x19] sm:$0xff]  ;;  %s2413_s7 = sshll.u32 %s3747_s9, 8 }
  0x15   : > { %364 = vrot.lane.b32.xlu1 %v2630_v0, %s2580_s17  ;;  %360 = vrot.lane.b32.xlu0 %v296_v1, %s2580_s17  ;;  %v297_v3 = vld [vmem:[%s2627_s16 + $0x9] sm:$0xff]  ;;  %v2647_v5 = vld [vmem:[%s2627_s16 + $0x21] sm:$0xff]  ;;  %s3616_s14 = scalar_lea.vmem %s3727_s2, %s2413_s7 }
  0x16   : > { %v2644_v4 = vld [vmem:[%s2627_s16 + $0x29] sm:$0xff]  ;;  %v2654_v6 = vld [vmem:[%s2627_s16 + $0x39] sm:$0xff]  ;;  %v2657_v7 = vld [vmem:[%s2627_s16 + $0x31] sm:$0xff] }
  0x17   : > { %v305_v8 = vld [vmem:[%s2627_s16 + $0x49] sm:$0xff]  ;;  %v304_v9 = vld [vmem:[%s2627_s16 + $0x41] sm:$0xff]  ;;  %v307_v10 = vld [vmem:[%s2627_s16 + $0x59] sm:$0xff] }
  0x18   : > { %v306_v11 = vld [vmem:[%s2627_s16 + $0x51] sm:$0xff]  ;;  %v231_v13 = vld [vmem:[%s2627_s16] sm:$0xff]  ;;  %v309_v14 = vld [vmem:[%s2627_s16 + $0x69] sm:$0xff] }
  0x19   : > { %366 = vrot.lane.b32.xlu1 %v2637_v2, %s2580_s17  ;;  %362 = vrot.lane.b32.xlu0 %v297_v3, %s2580_s17  ;;  %v2672_v12 = vld [vmem:[%s2627_s16 + $0x10] sm:$0xff]  ;;  %v308_v15 = vld [vmem:[%s2627_s16 + $0x61] sm:$0xff]  ;;  %264 = vst.msk [vmem:[#allocation2] sm:$0xff] %vm263_vm0, %v231_v13 }
  0x1a   : > { %266 = vst.msk [vmem:[#allocation2 + $0x10] sm:$0xff] %vm263_vm0, %v2672_v12  ;;  %v2681_v16 = vld [vmem:[%s2627_s16 + $0x18] sm:$0xff]  ;;  %v232_v17 = vld [vmem:[%s2627_s16 + $0x8] sm:$0xff]  ;;  %v2692_v20 = vld [vmem:[%s2627_s16 + $0x20] sm:$0xff] }
  0x1b   : > { %267 = vst.msk [vmem:[#allocation2 + $0x18] sm:$0xff] %vm263_vm0, %v2681_v16  ;;  %v311_v18 = vld [vmem:[%s2627_s16 + $0x79] sm:$0xff]  ;;  %265 = vst.msk [vmem:[#allocation2 + $0x8] sm:$0xff] %vm263_vm0, %v232_v17  ;;  %v2689_v19 = vld [vmem:[%s2627_s16 + $0x28] sm:$0xff] }
  0x1c   : > { %v310_v21 = vld [vmem:[%s2627_s16 + $0x71] sm:$0xff]  ;;  %269 = vst.msk [vmem:[#allocation2 + $0x28] sm:$0xff] %vm263_vm0, %v2689_v19  ;;  %268 = vst.msk [vmem:[#allocation2 + $0x20] sm:$0xff] %vm263_vm0, %v2692_v20  ;;  %v2710_v24 = vld [vmem:[%s2627_s16 + $0x48] sm:$0xff] }
  0x1d   : > { %370 = vrot.lane.b32.xlu1 %v2644_v4, %s2580_s17  ;;  %368 = vrot.lane.b32.xlu0 %v2647_v5, %s2580_s17  ;;  %v2702_v22 = vld [vmem:[%s2627_s16 + $0x38] sm:$0xff]  ;;  %v2707_v23 = vld [vmem:[%s2627_s16 + $0x30] sm:$0xff]  ;;  %273 = vst.msk [vmem:[#allocation2 + $0x48] sm:$0xff] %vm263_vm0, %v2710_v24 }
  0x1e   : > { %271 = vst.msk [vmem:[#allocation2 + $0x38] sm:$0xff] %vm263_vm0, %v2702_v22  ;;  %v2713_v25 = vld [vmem:[%s2627_s16 + $0x40] sm:$0xff]  ;;  %270 = vst.msk [vmem:[#allocation2 + $0x30] sm:$0xff] %vm263_vm0, %v2707_v23  ;;  %v2722_v26 = vld [vmem:[%s2627_s16 + $0x58] sm:$0xff] }
  0x1f   : > { %272 = vst.msk [vmem:[#allocation2 + $0x40] sm:$0xff] %vm263_vm0, %v2713_v25  ;;  %v2725_v27 = vld [vmem:[%s2627_s16 + $0x50] sm:$0xff]  ;;  %v2728_v28 = vld [vmem:[%s2627_s16 + $0x68] sm:$0xff]  ;;  %275 = vst.msk [vmem:[#allocation2 + $0x58] sm:$0xff] %vm263_vm0, %v2722_v26 }
  0x20   : > { %v313_v29 = vld [vmem:[%s2627_s16 + $0x89] sm:$0xff]  ;;  %v312_v30 = vld [vmem:[%s2627_s16 + $0x81] sm:$0xff]  ;;  %274 = vst.msk [vmem:[#allocation2 + $0x50] sm:$0xff] %vm263_vm0, %v2725_v27  ;;  %277 = vst.msk [vmem:[#allocation2 + $0x68] sm:$0xff] %vm263_vm0, %v2728_v28 }
  0x21   : > { %374 = vrot.lane.b32.xlu1 %v2654_v6, %s2580_s17  ;;  %372 = vrot.lane.b32.xlu0 %v2657_v7, %s2580_s17  ;;  %v2739_v31 = vld [vmem:[%s2627_s16 + $0x60] sm:$0xff]  ;;  %v2742_v32 = vld [vmem:[%s2627_s16 + $0x78] sm:$0xff] }
  0x22   : > { %v2745_v33 = vld [vmem:[%s2627_s16 + $0x70] sm:$0xff]  ;;  %276 = vst.msk [vmem:[#allocation2 + $0x60] sm:$0xff] %vm263_vm0, %v2739_v31  ;;  %279 = vst.msk [vmem:[#allocation2 + $0x78] sm:$0xff] %vm263_vm0, %v2742_v32  ;;  %v2756_v34 = vld [vmem:[%s2627_s16 + $0x88] sm:$0xff] }
  0x23   : > { %278 = vst.msk [vmem:[#allocation2 + $0x70] sm:$0xff] %vm263_vm0, %v2745_v33  ;;  %v2759_v35 = vld [vmem:[%s2627_s16 + $0x80] sm:$0xff]  ;;  %281 = vst.msk [vmem:[#allocation2 + $0x88] sm:$0xff] %vm263_vm0, %v2756_v34  ;;  %v2766_v36 = vld [vmem:[%s2627_s16 + $0x98] sm:$0xff] }
  0x24   : > { %280 = vst.msk [vmem:[#allocation2 + $0x80] sm:$0xff] %vm263_vm0, %v2759_v35  ;;  %v2769_v37 = vld [vmem:[%s2627_s16 + $0x90] sm:$0xff]  ;;  %v2772_v38 = vld [vmem:[%s2627_s16 + $0xa8] sm:$0xff]  ;;  %283 = vst.msk [vmem:[#allocation2 + $0x98] sm:$0xff] %vm263_vm0, %v2766_v36 }
  0x25   : > { %378 = vrot.lane.b32.xlu1 %v305_v8, %s2580_s17  ;;  %376 = vrot.lane.b32.xlu0 %v304_v9, %s2580_s17  ;;  %282 = vst.msk [vmem:[#allocation2 + $0x90] sm:$0xff] %vm263_vm0, %v2769_v37  ;;  %285 = vst.msk [vmem:[#allocation2 + $0xa8] sm:$0xff] %vm263_vm0, %v2772_v38  ;;  %v2781_v39 = vld [vmem:[%s2627_s16 + $0xa0] sm:$0xff]  ;;  %v2784_v40 = vld [vmem:[%s2627_s16 + $0xb8] sm:$0xff] }
  0x26   : > { %v2787_v41 = vld [vmem:[%s2627_s16 + $0xb0] sm:$0xff]  ;;  %284 = vst.msk [vmem:[#allocation2 + $0xa0] sm:$0xff] %vm263_vm0, %v2781_v39  ;;  %287 = vst.msk [vmem:[#allocation2 + $0xb8] sm:$0xff] %vm263_vm0, %v2784_v40  ;;  %v2798_v42 = vld [vmem:[%s2627_s16 + $0x99] sm:$0xff] }
  0x27   : > { %286 = vst.msk [vmem:[#allocation2 + $0xb0] sm:$0xff] %vm263_vm0, %v2787_v41  ;;  %v2801_v43 = vld [vmem:[%s2627_s16 + $0x91] sm:$0xff]  ;;  %v2804_v44 = vld [vmem:[%s2627_s16 + $0xc8] sm:$0xff]  ;;  %v2807_v45 = vld [vmem:[%s2627_s16 + $0xc0] sm:$0xff] }
  0x28   : > { %289 = vst.msk [vmem:[#allocation2 + $0xc8] sm:$0xff] %vm263_vm0, %v2804_v44  ;;  %288 = vst.msk [vmem:[#allocation2 + $0xc0] sm:$0xff] %vm263_vm0, %v2807_v45  ;;  %v2818_v46 = vld [vmem:[%s2627_s16 + $0xa9] sm:$0xff]  ;;  %v2821_v47 = vld [vmem:[%s2627_s16 + $0xa1] sm:$0xff] }
  0x29   : > { %382 = vrot.lane.b32.xlu1 %v307_v10, %s2580_s17  ;;  %380 = vrot.lane.b32.xlu0 %v306_v11, %s2580_s17  ;;  %v2824_v48 = vld [vmem:[%s2627_s16 + $0xd8] sm:$0xff]  ;;  %v2827_v49 = vld [vmem:[%s2627_s16 + $0xd0] sm:$0xff] }
  0x2a   : > { %291 = vst.msk [vmem:[#allocation2 + $0xd8] sm:$0xff] %vm263_vm0, %v2824_v48  ;;  %290 = vst.msk [vmem:[#allocation2 + $0xd0] sm:$0xff] %vm263_vm0, %v2827_v49  ;;  %v2838_v50 = vld [vmem:[%s2627_s16 + $0xb9] sm:$0xff]  ;;  %v2841_v51 = vld [vmem:[%s2627_s16 + $0xb1] sm:$0xff] }
  0x2b   : > { %v2844_v52 = vld [vmem:[%s2627_s16 + $0xe8] sm:$0xff]  ;;  %v2847_v53 = vld [vmem:[%s2627_s16 + $0xe0] sm:$0xff]  ;;  %v2862_v56 = vld [vmem:[%s2627_s16 + $0xf8] sm:$0xff] }
  0x2c   : > { %293 = vst.msk [vmem:[#allocation2 + $0xe8] sm:$0xff] %vm263_vm0, %v2844_v52  ;;  %292 = vst.msk [vmem:[#allocation2 + $0xe0] sm:$0xff] %vm263_vm0, %v2847_v53  ;;  %v321_v54 = vld [vmem:[%s2627_s16 + $0xc9] sm:$0xff]  ;;  %v2859_v55 = vld [vmem:[%s2627_s16 + $0xc1] sm:$0xff] }
  0x2d   : > { %386 = vrot.lane.b32.xlu1 %v309_v14, %s2580_s17  ;;  %384 = vrot.lane.b32.xlu0 %v308_v15, %s2580_s17  ;;  %3734 = vst [vmem:[#allocation3_spill] sm:$0xff] %v2859_v55  ;;  %v2865_v57 = vld [vmem:[%s2627_s16 + $0xf0] sm:$0xff]  ;;  %295 = vst.msk [vmem:[#allocation2 + $0xf8] sm:$0xff] %vm263_vm0, %v2862_v56  ;;  %v323_v58 = vld [vmem:[%s2627_s16 + $0xd9] sm:$0xff] }
  0x2e   : > { %294 = vst.msk [vmem:[#allocation2 + $0xf0] sm:$0xff] %vm263_vm0, %v2865_v57  ;;  %v322_v59 = vld [vmem:[%s2627_s16 + $0xd1] sm:$0xff]  ;;  %v325_v60 = vld [vmem:[%s2627_s16 + $0xe9] sm:$0xff]  ;;  %v324_v61 = vld [vmem:[%s2627_s16 + $0xe1] sm:$0xff] }
  0x2f   : > { %v327_v62 = vld [vmem:[%s2627_s16 + $0xf9] sm:$0xff]  ;;  %v326_v63 = vld [vmem:[%s2627_s16 + $0xf1] sm:$0xff]  ;;  %v489_v3 = vld [vmem:[%s2627_s16 + $0x2] sm:$0xff] }
  0x30   : > { %v490_v1 = vld [vmem:[%s2627_s16 + $0xa] sm:$0xff]  ;;  %v2891_v8 = vld [vmem:[%s2627_s16 + $0x1a] sm:$0xff]  ;;  %v2894_v9 = vld [vmem:[%s2627_s16 + $0x12] sm:$0xff] }
  0x31   : > { %390 = vrot.lane.b32.xlu1 %v311_v18, %s2580_s17  ;;  %388 = vrot.lane.b32.xlu0 %v310_v21, %s2580_s17  ;;  %v2901_v10 = vld [vmem:[%s2627_s16 + $0x2a] sm:$0xff]  ;;  %v2904_v11 = vld [vmem:[%s2627_s16 + $0x22] sm:$0xff] }
  0x32   : > { %v2911_v13 = vld [vmem:[%s2627_s16 + $0x3a] sm:$0xff]  ;;  %v2914_v14 = vld [vmem:[%s2627_s16 + $0x32] sm:$0xff]  ;;  %v498_v15 = vld [vmem:[%s2627_s16 + $0x4a] sm:$0xff] }
  0x33   : > { %v2922_v17 = vld [vmem:[%s2627_s16 + $0x42] sm:$0xff]  ;;  %v500_v18 = vld [vmem:[%s2627_s16 + $0x5a] sm:$0xff]  ;;  %v499_v21 = vld [vmem:[%s2627_s16 + $0x52] sm:$0xff] }
  0x34   : > { %3735 = vst [vmem:[#allocation4_spill] sm:$0xff] %v2922_v17 }
  0x35   : > { %394 = vrot.lane.b32.xlu1 %v313_v29, %s2580_s17  ;;  %392 = vrot.lane.b32.xlu0 %v312_v30, %s2580_s17  ;;  %v502_v29 = vld [vmem:[%s2627_s16 + $0x6a] sm:$0xff]  ;;  %v501_v30 = vld [vmem:[%s2627_s16 + $0x62] sm:$0xff] }
  0x39   : > { %398 = vrot.lane.b32.xlu1 %v2798_v42, %s2580_s17  ;;  %396 = vrot.lane.b32.xlu0 %v2801_v43, %s2580_s17 }
  0x3d   : > { %402 = vrot.lane.b32.xlu1 %v2818_v46, %s2580_s17  ;;  %400 = vrot.lane.b32.xlu0 %v2821_v47, %s2580_s17 }
  0x41   : > { %406 = vrot.lane.b32.xlu1 %v2838_v50, %s2580_s17  ;;  %404 = vrot.lane.b32.xlu0 %v2841_v51, %s2580_s17 }
  0x45   : > { %410 = vrot.lane.b32.xlu1 %v321_v54, %s2580_s17  ;;  %408 = vrot.lane.b32.xlu0 %v2859_v55, %s2580_s17  ;;  %v504_v54 = vld [vmem:[%s2627_s16 + $0x7a] sm:$0xff] }
  0x49   : > { %414 = vrot.lane.b32.xlu1 %v323_v58, %s2580_s17  ;;  %412 = vrot.lane.b32.xlu0 %v322_v59, %s2580_s17  ;;  %v503_v58 = vld [vmem:[%s2627_s16 + $0x72] sm:$0xff]  ;;  %v506_v59 = vld [vmem:[%s2627_s16 + $0x8a] sm:$0xff] }
  0x4d   : > { %418 = vrot.lane.b32.xlu1 %v325_v60, %s2580_s17  ;;  %416 = vrot.lane.b32.xlu0 %v324_v61, %s2580_s17  ;;  %v505_v60 = vld [vmem:[%s2627_s16 + $0x82] sm:$0xff]  ;;  %v2944_v61 = vld [vmem:[%s2627_s16 + $0x9a] sm:$0xff] }
  0x51   : > { %422 = vrot.lane.b32.xlu1 %v327_v62, %s2580_s17  ;;  %420 = vrot.lane.b32.xlu0 %v326_v63, %s2580_s17  ;;  %v2947_v62 = vld [vmem:[%s2627_s16 + $0x92] sm:$0xff]  ;;  %v2954_v63 = vld [vmem:[%s2627_s16 + $0xaa] sm:$0xff] }
  0x55   : > { %555 = vrot.lane.b32.xlu1 %v490_v1, %s2581_s18  ;;  %553 = vrot.lane.b32.xlu0 %v489_v3, %s2581_s18  ;;  %v2957_v1 = vld [vmem:[%s2627_s16 + $0xa2] sm:$0xff]  ;;  %v2964_v3 = vld [vmem:[%s2627_s16 + $0xba] sm:$0xff] }
  0x59   : > { %559 = vrot.lane.b32.xlu1 %v2891_v8, %s2581_s18  ;;  %557 = vrot.lane.b32.xlu0 %v2894_v9, %s2581_s18 }
  0x5d   : > { %563 = vrot.lane.b32.xlu1 %v2901_v10, %s2581_s18  ;;  %561 = vrot.lane.b32.xlu0 %v2904_v11, %s2581_s18 }
  0x61   : > { %567 = vrot.lane.b32.xlu1 %v2911_v13, %s2581_s18  ;;  %565 = vrot.lane.b32.xlu0 %v2914_v14, %s2581_s18 }
  0x65   : > { %571 = vrot.lane.b32.xlu1 %v498_v15, %s2581_s18  ;;  %569 = vrot.lane.b32.xlu0 %v2922_v17, %s2581_s18  ;;  %v2967_v15 = vld [vmem:[%s2627_s16 + $0xb2] sm:$0xff] }
  0x69   : > { %575 = vrot.lane.b32.xlu1 %v500_v18, %s2581_s18  ;;  %573 = vrot.lane.b32.xlu0 %v499_v21, %s2581_s18  ;;  %v2974_v18 = vld [vmem:[%s2627_s16 + $0xca] sm:$0xff]  ;;  %v2977_v21 = vld [vmem:[%s2627_s16 + $0xc2] sm:$0xff] }
  0x6a   : > { %3736 = vst [vmem:[#allocation5_spill] sm:$0xff] %v2974_v18  ;;  %3737 = vst [vmem:[#allocation6_spill] sm:$0xff] %v2977_v21 }
  0x6d   : > { %579 = vrot.lane.b32.xlu1 %v502_v29, %s2581_s18  ;;  %577 = vrot.lane.b32.xlu0 %v501_v30, %s2581_s18  ;;  %v516_v29 = vld [vmem:[%s2627_s16 + $0xda] sm:$0xff]  ;;  %v515_v30 = vld [vmem:[%s2627_s16 + $0xd2] sm:$0xff] }
  0x71   : > { %583 = vrot.lane.b32.xlu1 %v504_v54, %s2581_s18  ;;  %581 = vrot.lane.b32.xlu0 %v503_v58, %s2581_s18 }
  0x75   : > { %587 = vrot.lane.b32.xlu1 %v506_v59, %s2581_s18  ;;  %585 = vrot.lane.b32.xlu0 %v505_v60, %s2581_s18  ;;  %v518_v59 = vld [vmem:[%s2627_s16 + $0xea] sm:$0xff]  ;;  %v517_v60 = vld [vmem:[%s2627_s16 + $0xe2] sm:$0xff] }
  0x79   : > { %591 = vrot.lane.b32.xlu1 %v2944_v61, %s2581_s18  ;;  %589 = vrot.lane.b32.xlu0 %v2947_v62, %s2581_s18 }
  0x7d   : > { %595 = vrot.lane.b32.xlu1 %v2954_v63, %s2581_s18  ;;  %593 = vrot.lane.b32.xlu0 %v2957_v1, %s2581_s18 }
  0x81   : > { %599 = vrot.lane.b32.xlu1 %v2964_v3, %s2581_s18  ;;  %597 = vrot.lane.b32.xlu0 %v2967_v15, %s2581_s18 }
  0x85   : > { %603 = vrot.lane.b32.xlu1 %v2974_v18, %s2581_s18  ;;  %601 = vrot.lane.b32.xlu0 %v2977_v21, %s2581_s18  ;;  %v520_v21 = vld [vmem:[%s2627_s16 + $0xfa] sm:$0xff] }
  0x87   : > { %v365_v54 = vpop.permute.xlu1 %364  ;;  %v361_v58 = vpop.permute.xlu0 %360 }
  0x88   : > { %459 = vst.msk [vmem:[#allocation2 + $0x10] sm:$0xff] %vm456_vm1, %v365_v54  ;;  %457 = vst.msk [vmem:[#allocation2] sm:$0xff] %vm456_vm1, %v361_v58  ;;  %v519_v54 = vld [vmem:[%s2627_s16 + $0xf2] sm:$0xff] }
  0x89   : > { %607 = vrot.lane.b32.xlu1 %v516_v29, %s2581_s18  ;;  %605 = vrot.lane.b32.xlu0 %v515_v30, %s2581_s18 }
  0x8b   : > { %v367_v18 = vpop.permute.xlu1 %366  ;;  %v363_v17 = vpop.permute.xlu0 %362 }
  0x8c   : > { %460 = vst.msk [vmem:[#allocation2 + $0x18] sm:$0xff] %vm456_vm1, %v367_v18  ;;  %458 = vst.msk [vmem:[#allocation2 + $0x8] sm:$0xff] %vm456_vm1, %v363_v17 }
  0x8d   : > { %611 = vrot.lane.b32.xlu1 %v518_v59, %s2581_s18  ;;  %609 = vrot.lane.b32.xlu0 %v517_v60, %s2581_s18 }
  0x8f   : > { %v371_v55 = vpop.permute.xlu1 %370  ;;  %v369_v58 = vpop.permute.xlu0 %368 }
  0x90   : > { %462 = vst.msk [vmem:[#allocation2 + $0x28] sm:$0xff] %vm456_vm1, %v371_v55  ;;  %461 = vst.msk [vmem:[#allocation2 + $0x20] sm:$0xff] %vm456_vm1, %v369_v58 }
  0x91   : > { %615 = vrot.lane.b32.xlu1 %v520_v21, %s2581_s18  ;;  %613 = vrot.lane.b32.xlu0 %v519_v54, %s2581_s18 }
  0x93   : > { %v375_v29 = vpop.permute.xlu1 %374  ;;  %v373_v18 = vpop.permute.xlu0 %372 }
  0x94   : > { %464 = vst.msk [vmem:[#allocation2 + $0x38] sm:$0xff] %vm456_vm1, %v375_v29  ;;  %463 = vst.msk [vmem:[#allocation2 + $0x30] sm:$0xff] %vm456_vm1, %v373_v18 }
  0x95   : > { %748 = vrot.lane.b32.xlu1 %v2681_v16, %s2582_s19  ;;  %746 = vrot.lane.b32.xlu0 %v2672_v12, %s2582_s19 }
  0x97   : > { %v379_v55 = vpop.permute.xlu1 %378  ;;  %v377_v17 = vpop.permute.xlu0 %376 }
  0x98   : > { %466 = vst.msk [vmem:[#allocation2 + $0x48] sm:$0xff] %vm456_vm1, %v379_v55  ;;  %465 = vst.msk [vmem:[#allocation2 + $0x40] sm:$0xff] %vm456_vm1, %v377_v17 }
  0x99   : > { %752 = vrot.lane.b32.xlu1 %v2689_v19, %s2582_s19  ;;  %750 = vrot.lane.b32.xlu0 %v2692_v20, %s2582_s19 }
  0x9b   : > { %v383_v21 = vpop.permute.xlu1 %382  ;;  %v381_v30 = vpop.permute.xlu0 %380 }
  0x9c   : > { %468 = vst.msk [vmem:[#allocation2 + $0x58] sm:$0xff] %vm456_vm1, %v383_v21  ;;  %467 = vst.msk [vmem:[#allocation2 + $0x50] sm:$0xff] %vm456_vm1, %v381_v30 }
  0x9d   : > { %756 = vrot.lane.b32.xlu1 %v2702_v22, %s2582_s19  ;;  %754 = vrot.lane.b32.xlu0 %v2707_v23, %s2582_s19 }
  0x9f   : > { %v387_v12 = vpop.permute.xlu1 %386  ;;  %v385_v16 = vpop.permute.xlu0 %384 }
  0xa0   : > { %470 = vst.msk [vmem:[#allocation2 + $0x68] sm:$0xff] %vm456_vm1, %v387_v12  ;;  %469 = vst.msk [vmem:[#allocation2 + $0x60] sm:$0xff] %vm456_vm1, %v385_v16 }
  0xa1   : > { %760 = vrot.lane.b32.xlu1 %v2710_v24, %s2582_s19  ;;  %758 = vrot.lane.b32.xlu0 %v2713_v25, %s2582_s19 }
  0xa3   : > { %v391_v59 = vpop.permute.xlu1 %390  ;;  %v389_v60 = vpop.permute.xlu0 %388 }
  0xa4   : > { %472 = vst.msk [vmem:[#allocation2 + $0x78] sm:$0xff] %vm456_vm1, %v391_v59  ;;  %471 = vst.msk [vmem:[#allocation2 + $0x70] sm:$0xff] %vm456_vm1, %v389_v60 }
  0xa5   : > { %764 = vrot.lane.b32.xlu1 %v2722_v26, %s2582_s19  ;;  %762 = vrot.lane.b32.xlu0 %v2725_v27, %s2582_s19 }
  0xa7   : > { %v395_v54 = vpop.permute.xlu1 %394  ;;  %v393_v58 = vpop.permute.xlu0 %392 }
  0xa8   : > { %474 = vst.msk [vmem:[#allocation2 + $0x88] sm:$0xff] %vm456_vm1, %v395_v54  ;;  %473 = vst.msk [vmem:[#allocation2 + $0x80] sm:$0xff] %vm456_vm1, %v393_v58  ;;  %v713_v54 = vld [vmem:[%s2627_s16 + $0x108] sm:$0xff]  ;;  %v712_v58 = vld [vmem:[%s2627_s16 + $0x100] sm:$0xff] }
  0xa9   : > { %768 = vrot.lane.b32.xlu1 %v2728_v28, %s2582_s19  ;;  %766 = vrot.lane.b32.xlu0 %v2739_v31, %s2582_s19 }
  0xab   : > { %v399_v29 = vpop.permute.xlu1 %398  ;;  %v397_v18 = vpop.permute.xlu0 %396 }
  0xac   : > { %476 = vst.msk [vmem:[#allocation2 + $0x98] sm:$0xff] %vm456_vm1, %v399_v29  ;;  %475 = vst.msk [vmem:[#allocation2 + $0x90] sm:$0xff] %vm456_vm1, %v397_v18 }
  0xad   : > { %772 = vrot.lane.b32.xlu1 %v2742_v32, %s2582_s19  ;;  %770 = vrot.lane.b32.xlu0 %v2745_v33, %s2582_s19 }
  0xaf   : > { %v403_v55 = vpop.permute.xlu1 %402  ;;  %v401_v17 = vpop.permute.xlu0 %400 }
  0xb0   : > { %478 = vst.msk [vmem:[#allocation2 + $0xa8] sm:$0xff] %vm456_vm1, %v403_v55  ;;  %477 = vst.msk [vmem:[#allocation2 + $0xa0] sm:$0xff] %vm456_vm1, %v401_v17 }
  0xb1   : > { %776 = vrot.lane.b32.xlu1 %v2756_v34, %s2582_s19  ;;  %774 = vrot.lane.b32.xlu0 %v2759_v35, %s2582_s19 }
  0xb3   : > { %v407_v28 = vpop.permute.xlu1 %406  ;;  %v405_v31 = vpop.permute.xlu0 %404 }
  0xb4   : > { %480 = vst.msk [vmem:[#allocation2 + $0xb8] sm:$0xff] %vm456_vm1, %v407_v28  ;;  %479 = vst.msk [vmem:[#allocation2 + $0xb0] sm:$0xff] %vm456_vm1, %v405_v31 }
  0xb5   : > { %780 = vrot.lane.b32.xlu1 %v2766_v36, %s2582_s19  ;;  %778 = vrot.lane.b32.xlu0 %v2769_v37, %s2582_s19 }
  0xb7   : > { %v411_v32 = vpop.permute.xlu1 %410  ;;  %v409_v33 = vpop.permute.xlu0 %408 }
  0xb8   : > { %482 = vst.msk [vmem:[#allocation2 + $0xc8] sm:$0xff] %vm456_vm1, %v411_v32  ;;  %481 = vst.msk [vmem:[#allocation2 + $0xc0] sm:$0xff] %vm456_vm1, %v409_v33 }
  0xb9   : > { %784 = vrot.lane.b32.xlu1 %v2772_v38, %s2582_s19  ;;  %782 = vrot.lane.b32.xlu0 %v2781_v39, %s2582_s19 }
  0xbb   : > { %v415_v34 = vpop.permute.xlu1 %414  ;;  %v413_v35 = vpop.permute.xlu0 %412 }
  0xbc   : > { %484 = vst.msk [vmem:[#allocation2 + $0xd8] sm:$0xff] %vm456_vm1, %v415_v34  ;;  %483 = vst.msk [vmem:[#allocation2 + $0xd0] sm:$0xff] %vm456_vm1, %v413_v35 }
  0xbd   : > { %788 = vrot.lane.b32.xlu1 %v2784_v40, %s2582_s19  ;;  %786 = vrot.lane.b32.xlu0 %v2787_v41, %s2582_s19 }
  0xbf   : > { %v419_v36 = vpop.permute.xlu1 %418  ;;  %v417_v37 = vpop.permute.xlu0 %416 }
  0xc0   : > { %486 = vst.msk [vmem:[#allocation2 + $0xe8] sm:$0xff] %vm456_vm1, %v419_v36  ;;  %485 = vst.msk [vmem:[#allocation2 + $0xe0] sm:$0xff] %vm456_vm1, %v417_v37  ;;  %v1874_v36 = vld [vmem:[%s3726_s1 + $0x10] sm:$0xff]  ;;  %v1875_v37 = vld [vmem:[%s3726_s1 + $0x18] sm:$0xff] }
  0xc1   : > { %792 = vrot.lane.b32.xlu1 %v2804_v44, %s2582_s19  ;;  %790 = vrot.lane.b32.xlu0 %v2807_v45, %s2582_s19 }
  0xc3   : > { %v423_v21 = vpop.permute.xlu1 %422  ;;  %v421_v30 = vpop.permute.xlu0 %420 }
  0xc4   : > { %488 = vst.msk [vmem:[#allocation2 + $0xf8] sm:$0xff] %vm456_vm1, %v423_v21  ;;  %487 = vst.msk [vmem:[#allocation2 + $0xf0] sm:$0xff] %vm456_vm1, %v421_v30  ;;  %v1876_v30 = vld [vmem:[%s3726_s1 + $0x20] sm:$0xf] }
  0xc5   : > { %796 = vrot.lane.b32.xlu1 %v2824_v48, %s2582_s19  ;;  %794 = vrot.lane.b32.xlu0 %v2827_v49, %s2582_s19 }
  0xc7   : > { %v556_v12 = vpop.permute.xlu1 %555  ;;  %v554_v16 = vpop.permute.xlu0 %553 }
  0xc8   : > { %651 = vst.msk [vmem:[#allocation2 + $0x8] sm:$0xff] %vm649_vm2, %v556_v12  ;;  %650 = vst.msk [vmem:[#allocation2] sm:$0xff] %vm649_vm2, %v554_v16 }
  0xc9   : > { %800 = vrot.lane.b32.xlu1 %v2844_v52, %s2582_s19  ;;  %798 = vrot.lane.b32.xlu0 %v2847_v53, %s2582_s19 }
  0xcb   : > { %v560_v59 = vpop.permute.xlu1 %559  ;;  %v558_v60 = vpop.permute.xlu0 %557 }
  0xcc   : > { %653 = vst.msk [vmem:[#allocation2 + $0x18] sm:$0xff] %vm649_vm2, %v560_v59  ;;  %652 = vst.msk [vmem:[#allocation2 + $0x10] sm:$0xff] %vm649_vm2, %v558_v60 }
  0xcd   : > { %804 = vrot.lane.b32.xlu1 %v2862_v56, %s2582_s19  ;;  %802 = vrot.lane.b32.xlu0 %v2865_v57, %s2582_s19 }
  0xcf   : > { %v564_v29 = vpop.permute.xlu1 %563  ;;  %v562_v18 = vpop.permute.xlu0 %561 }
  0xd0   : > { %655 = vst.msk [vmem:[#allocation2 + $0x28] sm:$0xff] %vm649_vm2, %v564_v29  ;;  %654 = vst.msk [vmem:[#allocation2 + $0x20] sm:$0xff] %vm649_vm2, %v562_v18 }
  0xd1   : > { %808 = vrot.lane.b32.xlu1 %v713_v54, %s2582_s19  ;;  %806 = vrot.lane.b32.xlu0 %v712_v58, %s2582_s19 }
  0xd3   : > { %v568_v55 = vpop.permute.xlu1 %567  ;;  %v566_v17 = vpop.permute.xlu0 %565 }
  0xd4   : > { %657 = vst.msk [vmem:[#allocation2 + $0x38] sm:$0xff] %vm649_vm2, %v568_v55  ;;  %656 = vst.msk [vmem:[#allocation2 + $0x30] sm:$0xff] %vm649_vm2, %v566_v17 }
  0xd5   : > { %941 = vrot.lane.b32.xlu1 %v2637_v2, %s2583_s20  ;;  %939 = vrot.lane.b32.xlu0 %v2630_v0, %s2583_s20 }
  0xd7   : > { %v572_v56 = vpop.permute.xlu1 %571  ;;  %v570_v57 = vpop.permute.xlu0 %569 }
  0xd8   : > { %659 = vst.msk [vmem:[#allocation2 + $0x48] sm:$0xff] %vm649_vm2, %v572_v56  ;;  %658 = vst.msk [vmem:[#allocation2 + $0x40] sm:$0xff] %vm649_vm2, %v570_v57 }
  0xd9   : > { %945 = vrot.lane.b32.xlu1 %v2644_v4, %s2583_s20  ;;  %943 = vrot.lane.b32.xlu0 %v2647_v5, %s2583_s20 }
  0xdb   : > { %v576_v28 = vpop.permute.xlu1 %575  ;;  %v574_v31 = vpop.permute.xlu0 %573 }
  0xdc   : > { %661 = vst.msk [vmem:[#allocation2 + $0x58] sm:$0xff] %vm649_vm2, %v576_v28  ;;  %660 = vst.msk [vmem:[#allocation2 + $0x50] sm:$0xff] %vm649_vm2, %v574_v31 }
  0xdd   : > { %973 = vrot.lane.b32.xlu1 %v2798_v42, %s2583_s20  ;;  %971 = vrot.lane.b32.xlu0 %v2801_v43, %s2583_s20 }
  0xdf   : > { %v580_v0 = vpop.permute.xlu1 %579  ;;  %v578_v2 = vpop.permute.xlu0 %577 }
  0xe0   : > { %663 = vst.msk [vmem:[#allocation2 + $0x68] sm:$0xff] %vm649_vm2, %v580_v0  ;;  %662 = vst.msk [vmem:[#allocation2 + $0x60] sm:$0xff] %vm649_vm2, %v578_v2  ;;  %v897_v2 = vld [vmem:[%s2627_s16 + $0xc1] sm:$0xff] }
  0xe1   : > { %1164 = vrot.lane.b32.xlu1 %v2947_v62, %s2584_s21  ;;  %1132 = vrot.lane.b32.xlu0 %v2894_v9, %s2584_s21 }
  0xe3   : > { %v584_v32 = vpop.permute.xlu1 %583  ;;  %v582_v33 = vpop.permute.xlu0 %581 }
  0xe4   : > { %665 = vst.msk [vmem:[#allocation2 + $0x78] sm:$0xff] %vm649_vm2, %v584_v32  ;;  %664 = vst.msk [vmem:[#allocation2 + $0x70] sm:$0xff] %vm649_vm2, %v582_v33  ;;  %v1459_v33 = vld [vmem:[%s2627_s16 + $0x49] sm:$0xff] }
  0xe5   : > { %1166 = vrot.lane.b32.xlu1 %v2944_v61, %s2584_s21  ;;  %1134 = vrot.lane.b32.xlu0 %v2891_v8, %s2584_s21 }
  0xe7   : > { %v588_v42 = vpop.permute.xlu1 %587  ;;  %v586_v43 = vpop.permute.xlu0 %585 }
  0xe8   : > { %667 = vst.msk [vmem:[#allocation2 + $0x88] sm:$0xff] %vm649_vm2, %v588_v42  ;;  %666 = vst.msk [vmem:[#allocation2 + $0x80] sm:$0xff] %vm649_vm2, %v586_v43 }
  0xe9   : > { %1357 = vrot.lane.b32.xlu1 %v2781_v39, %s2585_s22  ;;  %1325 = vrot.lane.b32.xlu0 %v2692_v20, %s2585_s22 }
  0xeb   : > { %v592_v9 = vpop.permute.xlu1 %591  ;;  %v590_v62 = vpop.permute.xlu0 %589 }
  0xec   : > { %669 = vst.msk [vmem:[#allocation2 + $0x98] sm:$0xff] %vm649_vm2, %v592_v9  ;;  %668 = vst.msk [vmem:[#allocation2 + $0x90] sm:$0xff] %vm649_vm2, %v590_v62 }
  0xed   : > { %1359 = vrot.lane.b32.xlu1 %v2772_v38, %s2585_s22  ;;  %1327 = vrot.lane.b32.xlu0 %v2689_v19, %s2585_s22  ;;  %v1872_v38 = vld [vmem:[%s3726_s1] sm:$0xff]  ;;  %v1873_v19 = vld [vmem:[%s3726_s1 + $0x8] sm:$0xff] }
  0xee   : > { %v2509_v34 = vpack.c.bf16 %v1873_v19, %v1872_v38  ;;  %v1074_v38 = vld [vmem:[%s2627_s16 + $0x42] sm:$0xff] }
  0xef   : > { %v596_v8 = vpop.permute.xlu1 %595  ;;  %v594_v61 = vpop.permute.xlu0 %593 }
  0xf0   : > { %671 = vst.msk [vmem:[#allocation2 + $0xa8] sm:$0xff] %vm649_vm2, %v596_v8  ;;  %670 = vst.msk [vmem:[#allocation2 + $0xa0] sm:$0xff] %vm649_vm2, %v594_v61  ;;  %2510 = vmatprep.subr.bf16.mxu0 %v2509_v34  ;;  %2517 = vmatprep.subr.bf16.mxu1 %v2509_v34  ;;  %v3739_v8 = vld [vmem:[#allocation6_spill] sm:$0xff]  ;;  %v3740_v61 = vld [vmem:[#allocation4_spill] sm:$0xff] }
  0xf1   : > { %1550 = vrot.lane.b32.xlu1 %v2821_v47, %s2586_s23  ;;  %1518 = vrot.lane.b32.xlu0 %v2647_v5, %s2586_s23 }
  0xf2   : > { %2512 = vmatpush3.bf16.msra.mxu0 %v2509_v34  ;;  %2520 = vmatpush3.bf16.msra.mxu1 %v2509_v34 }
  0xf3   : > { %v600_v20 = vpop.permute.xlu1 %599  ;;  %v598_v39 = vpop.permute.xlu0 %597 }
  0xf4   : > { %673 = vst.msk [vmem:[#allocation2 + $0xb8] sm:$0xff] %vm649_vm2, %v600_v20  ;;  %672 = vst.msk [vmem:[#allocation2 + $0xb0] sm:$0xff] %vm649_vm2, %v598_v39 }
  0xf5   : > { %1520 = vrot.lane.b32.xlu1 %v2644_v4, %s2586_s23  ;;  %975 = vrot.lane.b32.xlu0 %v2821_v47, %s2583_s20  ;;  %v2513_v4 = vpack.c.bf16 %v1875_v37, %v1874_v36  ;;  %v3741_v37 = vld [vmem:[#allocation5_spill] sm:$0xff] }
  0xf7   : > { %v604_v5 = vpop.permute.xlu1 %603  ;;  %v602_v35 = vpop.permute.xlu0 %601  ;;  %2514 = vmatprep.subr.bf16.mxu0 %v2513_v4  ;;  %2518 = vmatprep.subr.bf16.mxu1 %v2513_v4 }
  0xf8   : > { %675 = vst.msk [vmem:[#allocation2 + $0xc8] sm:$0xff] %vm649_vm2, %v604_v5  ;;  %674 = vst.msk [vmem:[#allocation2 + $0xc0] sm:$0xff] %vm649_vm2, %v602_v35  ;;  %2516 = vmatpush3.bf16.msra.mxu0 %v2513_v4  ;;  %2521 = vmatpush3.bf16.msra.mxu1 %v2513_v4  ;;  %v1652_v5 = vld [vmem:[%s2627_s16 + $0x4a] sm:$0xff] }
  0xf9   : > { %1711 = vrot.lane.b32.xlu1 %v2904_v11, %s2587_s4  ;;  %1552 = vrot.lane.b32.xlu0 %v2818_v46, %s2586_s23 }
  0xfa   : > { %2459 = vmatprep.subr.msk.mxu0 %vm1974_vm3, %v1876_v30  ;;  %2519 = vmatprep.subr.msk.mxu1 %vm1974_vm3, %v1876_v30 }
  0xfb   : > { %v608_v47 = vpop.permute.xlu1 %607  ;;  %v606_v21 = vpop.permute.xlu0 %605 }
  0xfc   : > { %677 = vst.msk [vmem:[#allocation2 + $0xd8] sm:$0xff] %vm649_vm2, %v608_v47  ;;  %676 = vst.msk [vmem:[#allocation2 + $0xd0] sm:$0xff] %vm649_vm2, %v606_v21  ;;  %2460 = vmatpush3.msk.msra.mxu0 %vm1974_vm3, %v1876_v30  ;;  %2522 = vmatpush3.msk.msra.mxu1 %vm1974_vm3, %v1876_v30 }
  0xfd   : > { %977 = vrot.lane.b32.xlu1 %v2818_v46, %s2583_s20  ;;  %1743 = vrot.lane.b32.xlu0 %v2957_v1, %s2587_s4 }
  0xff   : > { %v612_v12 = vpop.permute.xlu1 %611  ;;  %v610_v16 = vpop.permute.xlu0 %609 }
 0x100   : > { %679 = vst.msk [vmem:[#allocation2 + $0xe8] sm:$0xff] %vm649_vm2, %v612_v12  ;;  %678 = vst.msk [vmem:[#allocation2 + $0xe0] sm:$0xff] %vm649_vm2, %v610_v16 }
 0x101   : > { %1168 = vrot.lane.b32.xlu1 %v2957_v1, %s2584_s21  ;;  %1136 = vrot.lane.b32.xlu0 %v2904_v11, %s2584_s21 }
 0x103   : > { %v616_v46 = vpop.permute.xlu1 %615  ;;  %v614_v59 = vpop.permute.xlu0 %613 }
 0x104   : > { %681 = vst.msk [vmem:[#allocation2 + $0xf8] sm:$0xff] %vm649_vm2, %v616_v46  ;;  %680 = vst.msk [vmem:[#allocation2 + $0xf0] sm:$0xff] %vm649_vm2, %v614_v59  ;;  %v1476_v46 = vld [vmem:[%s2627_s16 + $0xd1] sm:$0xff] }
 0x105   : > { %1745 = vrot.lane.b32.xlu1 %v2954_v63, %s2587_s4  ;;  %1713 = vrot.lane.b32.xlu0 %v2901_v10, %s2587_s4 }
 0x107   : > { %v749_v60 = vpop.permute.xlu1 %748  ;;  %v747_v54 = vpop.permute.xlu0 %746 }
 0x108   : > { %844 = vst.msk [vmem:[#allocation2 + $0x8] sm:$0xff] %vm842_vm4, %v749_v60  ;;  %843 = vst.msk [vmem:[#allocation2] sm:$0xff] %vm842_vm4, %v747_v54  ;;  %v1461_v54 = vld [vmem:[%s2627_s16 + $0x59] sm:$0xff] }
 0x109   : > { %1170 = vrot.lane.b32.xlu1 %v2954_v63, %s2584_s21  ;;  %1138 = vrot.lane.b32.xlu0 %v2901_v10, %s2584_s21 }
 0x10b   : > { %v753_v11 = vpop.permute.xlu1 %752  ;;  %v751_v1 = vpop.permute.xlu0 %750 }
 0x10c   : > { %846 = vst.msk [vmem:[#allocation2 + $0x18] sm:$0xff] %vm842_vm4, %v753_v11  ;;  %845 = vst.msk [vmem:[#allocation2 + $0x10] sm:$0xff] %vm842_vm4, %v751_v1 }
 0x10d   : > { %1361 = vrot.lane.b32.xlu1 %v2787_v41, %s2585_s22  ;;  %1329 = vrot.lane.b32.xlu0 %v2707_v23, %s2585_s22 }
 0x10f   : > { %v757_v58 = vpop.permute.xlu1 %756  ;;  %v755_v29 = vpop.permute.xlu0 %754 }
 0x110   : > { %848 = vst.msk [vmem:[#allocation2 + $0x28] sm:$0xff] %vm842_vm4, %v757_v58  ;;  %847 = vst.msk [vmem:[#allocation2 + $0x20] sm:$0xff] %vm842_vm4, %v755_v29  ;;  %v1669_v58 = vld [vmem:[%s2627_s16 + $0xd2] sm:$0xff] }
 0x111   : > { %1363 = vrot.lane.b32.xlu1 %v2784_v40, %s2585_s22  ;;  %1331 = vrot.lane.b32.xlu0 %v2702_v22, %s2585_s22  ;;  %v1653_v29 = vld [vmem:[%s2627_s16 + $0x52] sm:$0xff] }
 0x113   : > { %v761_v10 = vpop.permute.xlu1 %760  ;;  %v759_v63 = vpop.permute.xlu0 %758 }
 0x114   : > { %850 = vst.msk [vmem:[#allocation2 + $0x38] sm:$0xff] %vm842_vm4, %v761_v10  ;;  %849 = vst.msk [vmem:[#allocation2 + $0x30] sm:$0xff] %vm842_vm4, %v759_v63 }
 0x115   : > { %1554 = vrot.lane.b32.xlu1 %v2841_v51, %s2586_s23  ;;  %1522 = vrot.lane.b32.xlu0 %v2657_v7, %s2586_s23 }
 0x117   : > { %v765_v23 = vpop.permute.xlu1 %764  ;;  %v763_v41 = vpop.permute.xlu0 %762 }
 0x118   : > { %852 = vst.msk [vmem:[#allocation2 + $0x48] sm:$0xff] %vm842_vm4, %v765_v23  ;;  %851 = vst.msk [vmem:[#allocation2 + $0x40] sm:$0xff] %vm842_vm4, %v763_v41 }
 0x119   : > { %979 = vrot.lane.b32.xlu1 %v2841_v51, %s2583_s20  ;;  %947 = vrot.lane.b32.xlu0 %v2657_v7, %s2583_s20 }
 0x11b   : > { %v769_v22 = vpop.permute.xlu1 %768  ;;  %v767_v40 = vpop.permute.xlu0 %766 }
 0x11c   : > { %854 = vst.msk [vmem:[#allocation2 + $0x58] sm:$0xff] %vm842_vm4, %v769_v22  ;;  %853 = vst.msk [vmem:[#allocation2 + $0x50] sm:$0xff] %vm842_vm4, %v767_v40 }
 0x11d   : > { %1556 = vrot.lane.b32.xlu1 %v2838_v50, %s2586_s23  ;;  %1524 = vrot.lane.b32.xlu0 %v2654_v6, %s2586_s23 }
 0x11f   : > { %v773_v18 = vpop.permute.xlu1 %772  ;;  %v771_v55 = vpop.permute.xlu0 %770 }
 0x120   : > { %856 = vst.msk [vmem:[#allocation2 + $0x68] sm:$0xff] %vm842_vm4, %v773_v18  ;;  %855 = vst.msk [vmem:[#allocation2 + $0x60] sm:$0xff] %vm842_vm4, %v771_v55 }
 0x121   : > { %1747 = vrot.lane.b32.xlu1 %v2967_v15, %s2587_s4  ;;  %1715 = vrot.lane.b32.xlu0 %v2914_v14, %s2587_s4 }
 0x123   : > { %v777_v7 = vpop.permute.xlu1 %776  ;;  %v775_v51 = vpop.permute.xlu0 %774 }
 0x124   : > { %858 = vst.msk [vmem:[#allocation2 + $0x78] sm:$0xff] %vm842_vm4, %v777_v7  ;;  %857 = vst.msk [vmem:[#allocation2 + $0x70] sm:$0xff] %vm842_vm4, %v775_v51  ;;  %v1670_v7 = vld [vmem:[%s2627_s16 + $0xda] sm:$0xff] }
 0x125   : > { %981 = vrot.lane.b32.xlu1 %v2838_v50, %s2583_s20  ;;  %949 = vrot.lane.b32.xlu0 %v2654_v6, %s2583_s20  ;;  %v1654_v51 = vld [vmem:[%s2627_s16 + $0x5a] sm:$0xff] }
 0x127   : > { %v781_v17 = vpop.permute.xlu1 %780  ;;  %v779_v56 = vpop.permute.xlu0 %778 }
 0x128   : > { %860 = vst.msk [vmem:[#allocation2 + $0x88] sm:$0xff] %vm842_vm4, %v781_v17  ;;  %859 = vst.msk [vmem:[#allocation2 + $0x80] sm:$0xff] %vm842_vm4, %v779_v56 }
 0x129   : > { %1172 = vrot.lane.b32.xlu1 %v2967_v15, %s2584_s21  ;;  %1140 = vrot.lane.b32.xlu0 %v2914_v14, %s2584_s21 }
 0x12b   : > { %v785_v57 = vpop.permute.xlu1 %784  ;;  %v783_v28 = vpop.permute.xlu0 %782 }
 0x12c   : > { %862 = vst.msk [vmem:[#allocation2 + $0x98] sm:$0xff] %vm842_vm4, %v785_v57  ;;  %861 = vst.msk [vmem:[#allocation2 + $0x90] sm:$0xff] %vm842_vm4, %v783_v28 }
 0x12d   : > { %1749 = vrot.lane.b32.xlu1 %v2964_v3, %s2587_s4  ;;  %1717 = vrot.lane.b32.xlu0 %v2911_v13, %s2587_s4 }
 0x12f   : > { %v789_v6 = vpop.permute.xlu1 %788  ;;  %v787_v50 = vpop.permute.xlu0 %786 }
 0x130   : > { %864 = vst.msk [vmem:[#allocation2 + $0xa8] sm:$0xff] %vm842_vm4, %v789_v6  ;;  %863 = vst.msk [vmem:[#allocation2 + $0xa0] sm:$0xff] %vm842_vm4, %v787_v50 }
 0x131   : > { %1174 = vrot.lane.b32.xlu1 %v2964_v3, %s2584_s21  ;;  %1142 = vrot.lane.b32.xlu0 %v2911_v13, %s2584_s21  ;;  %v1458_v13 = vld [vmem:[%s2627_s16 + $0x41] sm:$0xff] }
 0x133   : > { %v793_v14 = vpop.permute.xlu1 %792  ;;  %v791_v15 = vpop.permute.xlu0 %790 }
 0x134   : > { %866 = vst.msk [vmem:[#allocation2 + $0xb8] sm:$0xff] %vm842_vm4, %v793_v14  ;;  %865 = vst.msk [vmem:[#allocation2 + $0xb0] sm:$0xff] %vm842_vm4, %v791_v15  ;;  %v1269_v14 = vld [vmem:[%s2627_s16 + $0x60] sm:$0xff] }
 0x135   : > { %1365 = vrot.lane.b32.xlu1 %v2807_v45, %s2585_s22  ;;  %1333 = vrot.lane.b32.xlu0 %v2713_v25, %s2585_s22  ;;  %v3738_v25 = vld [vmem:[#allocation3_spill] sm:$0xff] }
 0x137   : > { %v797_v31 = vpop.permute.xlu1 %796  ;;  %v795_v0 = vpop.permute.xlu0 %794 }
 0x138   : > { %868 = vst.msk [vmem:[#allocation2 + $0xc8] sm:$0xff] %vm842_vm4, %v797_v31  ;;  %867 = vst.msk [vmem:[#allocation2 + $0xc0] sm:$0xff] %vm842_vm4, %v795_v0  ;;  %v1270_v0 = vld [vmem:[%s2627_s16 + $0x68] sm:$0xff] }
 0x139   : > { %1367 = vrot.lane.b32.xlu1 %v2804_v44, %s2585_s22  ;;  %1335 = vrot.lane.b32.xlu0 %v2710_v24, %s2585_s22  ;;  %v1475_v24 = vld [vmem:[%s2627_s16 + $0xc9] sm:$0xff] }
 0x13b   : > { %v801_v3 = vpop.permute.xlu1 %800  ;;  %v799_v45 = vpop.permute.xlu0 %798 }
 0x13c   : > { %870 = vst.msk [vmem:[#allocation2 + $0xd8] sm:$0xff] %vm842_vm4, %v801_v3  ;;  %869 = vst.msk [vmem:[#allocation2 + $0xd0] sm:$0xff] %vm842_vm4, %v799_v45  ;;  %v1478_v45 = vld [vmem:[%s2627_s16 + $0xe1] sm:$0xff] }
 0x13d   : > { %1558 = vrot.lane.b32.xlu1 %v3738_v25, %s2586_s23  ;;  %1526 = vrot.lane.b32.xlu0 %v1458_v13, %s2586_s23  ;;  %v1462_v25 = vld [vmem:[%s2627_s16 + $0x61] sm:$0xff] }
 0x13f   : > { %v805_v32 = vpop.permute.xlu1 %804  ;;  %v803_v44 = vpop.permute.xlu0 %802 }
 0x140   : > { %872 = vst.msk [vmem:[#allocation2 + $0xe8] sm:$0xff] %vm842_vm4, %v805_v32  ;;  %871 = vst.msk [vmem:[#allocation2 + $0xe0] sm:$0xff] %vm842_vm4, %v803_v44  ;;  %v1479_v44 = vld [vmem:[%s2627_s16 + $0xe9] sm:$0xff] }
 0x141   : > { %983 = vrot.lane.b32.xlu1 %v897_v2, %s2583_s20  ;;  %951 = vrot.lane.b32.xlu0 %v1458_v13, %s2583_s20 }
 0x143   : > { %v809_v42 = vpop.permute.xlu1 %808  ;;  %v807_v43 = vpop.permute.xlu0 %806 }
 0x144   : > { %874 = vst.msk [vmem:[#allocation2 + $0xf8] sm:$0xff] %vm842_vm4, %v809_v42  ;;  %873 = vst.msk [vmem:[#allocation2 + $0xf0] sm:$0xff] %vm842_vm4, %v807_v43  ;;  %v1671_v43 = vld [vmem:[%s2627_s16 + $0xe2] sm:$0xff] }
 0x145   : > { %1560 = vrot.lane.b32.xlu1 %v1475_v24, %s2586_s23  ;;  %1528 = vrot.lane.b32.xlu0 %v1459_v33, %s2586_s23 }
 0x147   : > { %v942_v9 = vpop.permute.xlu1 %941  ;;  %v940_v62 = vpop.permute.xlu0 %939 }
 0x148   : > { %1037 = vst.msk [vmem:[#allocation2 + $0x8] sm:$0xff] %vm1035_vm5, %v942_v9  ;;  %1036 = vst.msk [vmem:[#allocation2] sm:$0xff] %vm1035_vm5, %v940_v62  ;;  %v1655_v9 = vld [vmem:[%s2627_s16 + $0x62] sm:$0xff] }
 0x149   : > { %1751 = vrot.lane.b32.xlu1 %v3739_v8, %s2587_s4  ;;  %1719 = vrot.lane.b32.xlu0 %v3740_v61, %s2587_s4 }
 0x14b   : > { %v946_v20 = vpop.permute.xlu1 %945  ;;  %v944_v39 = vpop.permute.xlu0 %943 }
 0x14c   : > { %1039 = vst.msk [vmem:[#allocation2 + $0x18] sm:$0xff] %vm1035_vm5, %v946_v20  ;;  %1038 = vst.msk [vmem:[#allocation2 + $0x10] sm:$0xff] %vm1035_vm5, %v944_v39 }
 0x14d   : > { %985 = vrot.lane.b32.xlu1 %v1475_v24, %s2583_s20  ;;  %953 = vrot.lane.b32.xlu0 %v1459_v33, %s2583_s20  ;;  %v1463_v24 = vld [vmem:[%s2627_s16 + $0x69] sm:$0xff] }
 0x14f   : > { %v974_v19 = vpop.permute.xlu1 %973  ;;  %v972_v34 = vpop.permute.xlu0 %971 }
 0x150   : > { %1053 = vst.msk [vmem:[#allocation2 + $0x88] sm:$0xff] %vm1035_vm5, %v974_v19  ;;  %1052 = vst.msk [vmem:[#allocation2 + $0x80] sm:$0xff] %vm1035_vm5, %v972_v34 }
 0x151   : > { %1176 = vrot.lane.b32.xlu1 %v3739_v8, %s2584_s21  ;;  %1144 = vrot.lane.b32.xlu0 %v1074_v38, %s2584_s21 }
 0x153   : > { %v1165_v35 = vpop.permute.xlu1 %1164  ;;  %v1133_v36 = vpop.permute.xlu0 %1132 }
 0x154   : > { %1245 = vst.msk [vmem:[#allocation2 + $0x80] sm:$0xff] %vm1228_vm6, %v1165_v35  ;;  %1229 = vst.msk [vmem:[#allocation2] sm:$0xff] %vm1228_vm6, %v1133_v36  ;;  %v1656_v35 = vld [vmem:[%s2627_s16 + $0x6a] sm:$0xff] }
 0x155   : > { %1753 = vrot.lane.b32.xlu1 %v3741_v37, %s2587_s4  ;;  %1721 = vrot.lane.b32.xlu0 %v1652_v5, %s2587_s4 }
 0x157   : > { %v1167_v4 = vpop.permute.xlu1 %1166  ;;  %v1135_v47 = vpop.permute.xlu0 %1134 }
 0x158   : > { %1246 = vst.msk [vmem:[#allocation2 + $0x88] sm:$0xff] %vm1228_vm6, %v1167_v4  ;;  %1230 = vst.msk [vmem:[#allocation2 + $0x8] sm:$0xff] %vm1228_vm6, %v1135_v47 }
 0x159   : > { %1178 = vrot.lane.b32.xlu1 %v3741_v37, %s2584_s21  ;;  %1146 = vrot.lane.b32.xlu0 %v1652_v5, %s2584_s21  ;;  %v1672_v5 = vld [vmem:[%s2627_s16 + $0xea] sm:$0xff] }
 0x15b   : > { %v1358_v21 = vpop.permute.xlu1 %1357  ;;  %v1326_v30 = vpop.permute.xlu0 %1325 }
 0x15c   : > { %1438 = vst.msk [vmem:[#allocation2 + $0x80] sm:$0xff] %vm1421_vm7, %v1358_v21  ;;  %1422 = vst.msk [vmem:[#allocation2] sm:$0xff] %vm1421_vm7, %v1326_v30 }
 0x15d   : > { %1369 = vrot.lane.b32.xlu1 %v2827_v49, %s2585_s22  ;;  %1337 = vrot.lane.b32.xlu0 %v2725_v27, %s2585_s22  ;;  %v1460_v49 = vld [vmem:[%s2627_s16 + $0x51] sm:$0xff] }
 0x15f   : > { %v1360_v12 = vpop.permute.xlu1 %1359  ;;  %v1328_v16 = vpop.permute.xlu0 %1327 }
 0x160   : > { %1439 = vst.msk [vmem:[#allocation2 + $0x88] sm:$0xff] %vm1421_vm7, %v1360_v12  ;;  %1423 = vst.msk [vmem:[#allocation2 + $0x8] sm:$0xff] %vm1421_vm7, %v1328_v16  ;;  %v1287_v12 = vld [vmem:[%s2627_s16 + $0xf0] sm:$0xff] }
 0x161   : > { %1371 = vrot.lane.b32.xlu1 %v2824_v48, %s2585_s22  ;;  %1339 = vrot.lane.b32.xlu0 %v2722_v26, %s2585_s22  ;;  %v1477_v26 = vld [vmem:[%s2627_s16 + $0xd9] sm:$0xff]  ;;  %v1271_v16 = vld [vmem:[%s2627_s16 + $0x70] sm:$0xff] }
 0x163   : > { %v1551_v59 = vpop.permute.xlu1 %1550  ;;  %v1519_v60 = vpop.permute.xlu0 %1518 }
 0x164   : > { %1631 = vst.msk [vmem:[#allocation2 + $0x80] sm:$0xff] %vm1614_vm8, %v1551_v59  ;;  %1615 = vst.msk [vmem:[#allocation2] sm:$0xff] %vm1614_vm8, %v1519_v60  ;;  %v1288_v59 = vld [vmem:[%s2627_s16 + $0xf8] sm:$0xff] }
 0x165   : > { %1562 = vrot.lane.b32.xlu1 %v1476_v46, %s2586_s23  ;;  %1530 = vrot.lane.b32.xlu0 %v1460_v49, %s2586_s23  ;;  %v1272_v60 = vld [vmem:[%s2627_s16 + $0x78] sm:$0xff] }
 0x167   : > { %v1521_v27 = vpop.permute.xlu1 %1520  ;;  %v976_v48 = vpop.permute.xlu0 %975 }
 0x168   : > { %1616 = vst.msk [vmem:[#allocation2 + $0x8] sm:$0xff] %vm1614_vm8, %v1521_v27 }
 0x169   : > { %1054 = vst.msk [vmem:[#allocation2 + $0x90] sm:$0xff] %vm1035_vm5, %v976_v48  ;;  %987 = vrot.lane.b32.xlu1 %v1476_v46, %s2583_s20  ;;  %955 = vrot.lane.b32.xlu0 %v1460_v49, %s2583_s20 }
 0x16b   : > { %v1712_v11 = vpop.permute.xlu1 %1711  ;;  %v1553_v1 = vpop.permute.xlu0 %1552 }
 0x16c   : > { %1808 = vst.msk [vmem:[#allocation2] sm:$0xff] %vm1807_vm9, %v1712_v11 }
 0x16d   : > { %1632 = vst.msk [vmem:[#allocation2 + $0x88] sm:$0xff] %vm1614_vm8, %v1553_v1  ;;  %1564 = vrot.lane.b32.xlu1 %v1477_v26, %s2586_s23  ;;  %1532 = vrot.lane.b32.xlu0 %v1461_v54, %s2586_s23 }
 0x16f   : > { %v978_v10 = vpop.permute.xlu1 %977  ;;  %v1744_v63 = vpop.permute.xlu0 %1743 }
 0x170   : > { %1055 = vst.msk [vmem:[#allocation2 + $0x98] sm:$0xff] %vm1035_vm5, %v978_v10  ;;  %v1481_v10 = vld [vmem:[%s2627_s16 + $0xf9] sm:$0xff] }
 0x171   : > { %1824 = vst.msk [vmem:[#allocation2 + $0x80] sm:$0xff] %vm1807_vm9, %v1744_v63  ;;  %1755 = vrot.lane.b32.xlu1 %v1669_v58, %s2587_s4  ;;  %1723 = vrot.lane.b32.xlu0 %v1653_v29, %s2587_s4  ;;  %v1465_v63 = vld [vmem:[%s2627_s16 + $0x79] sm:$0xff] }
 0x173   : > { %v1169_v23 = vpop.permute.xlu1 %1168  ;;  %v1137_v41 = vpop.permute.xlu0 %1136  ;;  %v1840_v22 = vld [vmem:[#allocation2] sm:$0xff] }
 0x174   : > { %1247 = vst.msk [vmem:[#allocation2 + $0x90] sm:$0xff] %vm1228_vm6, %v1169_v23  ;;  %1231 = vst.msk [vmem:[#allocation2 + $0x10] sm:$0xff] %vm1228_vm6, %v1137_v41  ;;  %2461 = vmatprep.mubr.msk.f32.mxu0 %vm1877_vm10, %v1840_v22  ;;  %v1673_v22 = vld [vmem:[%s2627_s16 + $0xf2] sm:$0xff] }
 0x175   : > { %989 = vrot.lane.b32.xlu1 %v1477_v26, %s2583_s20  ;;  %957 = vrot.lane.b32.xlu0 %v1461_v54, %s2583_s20  ;;  %v1480_v26 = vld [vmem:[%s2627_s16 + $0xf1] sm:$0xff] }
 0x176   : > { %v1464_v54 = vld [vmem:[%s2627_s16 + $0x71] sm:$0xff] }
 0x177   : > { %v1746_v40 = vpop.permute.xlu1 %1745  ;;  %v1714_v18 = vpop.permute.xlu0 %1713 }
 0x178   : > { %v1856_v55 = vld [vmem:[#allocation2 + $0x80] sm:$0xff]  ;;  %1825 = vst.msk [vmem:[#allocation2 + $0x88] sm:$0xff] %vm1807_vm9, %v1746_v40  ;;  %1809 = vst.msk [vmem:[#allocation2 + $0x8] sm:$0xff] %vm1807_vm9, %v1714_v18  ;;  %v1657_v40 = vld [vmem:[%s2627_s16 + $0x72] sm:$0xff] }
 0x179   : > { %2485 = vmatprep.mubr.msk.f32.mxu1 %vm1877_vm10, %v1856_v55  ;;  %1180 = vrot.lane.b32.xlu1 %v1669_v58, %s2584_s21 }
 0x17a   : > { %1148 = vrot.lane.b32.xlu0 %v1653_v29, %s2584_s21 }
 0x17b   : > { %v1171_v17 = vpop.permute.xlu1 %1170  ;;  %v1139_v56 = vpop.permute.xlu0 %1138 }
 0x17c   : > { %1248 = vst.msk [vmem:[#allocation2 + $0x98] sm:$0xff] %vm1228_vm6, %v1171_v17  ;;  %1232 = vst.msk [vmem:[#allocation2 + $0x18] sm:$0xff] %vm1228_vm6, %v1139_v56 }
 0x17d   : > { %1757 = vrot.lane.b32.xlu1 %v1670_v7, %s2587_s4 }
 0x17e   : > { %1725 = vrot.lane.b32.xlu0 %v1654_v51, %s2587_s4 }
 0x17f   : > { %v1362_v57 = vpop.permute.xlu1 %1361  ;;  %v1330_v28 = vpop.permute.xlu0 %1329  ;;  %v1841_v6 = vld [vmem:[#allocation2 + $0x8] sm:$0xff] }
 0x180   : > { %v1857_v50 = vld [vmem:[#allocation2 + $0x88] sm:$0xff]  ;;  %1440 = vst.msk [vmem:[#allocation2 + $0x90] sm:$0xff] %vm1421_vm7, %v1362_v57  ;;  %1424 = vst.msk [vmem:[#allocation2 + $0x10] sm:$0xff] %vm1421_vm7, %v1330_v28  ;;  %2462 = vmatmul.mubr.msk.f32.vlgmr.msra.gmra.mrb[0].mxu0 %vm1877_vm10, %v1841_v6  ;;  %v1674_v6 = vld [vmem:[%s2627_s16 + $0xfa] sm:$0xff] }
 0x181   : > { %2486 = vmatmul.mubr.msk.f32.vlgmr.msra.gmra.mrb[0].mxu1 %vm1877_vm10, %v1857_v50  ;;  %1182 = vrot.lane.b32.xlu1 %v1670_v7, %s2584_s21  ;;  %v1658_v50 = vld [vmem:[%s2627_s16 + $0x7a] sm:$0xff] }
 0x182   : > { %1150 = vrot.lane.b32.xlu0 %v1654_v51, %s2584_s21 }
 0x183   : > { %v1364_v15 = vpop.permute.xlu1 %1363  ;;  %v1332_v31 = vpop.permute.xlu0 %1331 }
 0x184   : > { %1441 = vst.msk [vmem:[#allocation2 + $0x98] sm:$0xff] %vm1421_vm7, %v1364_v15  ;;  %1425 = vst.msk [vmem:[#allocation2 + $0x18] sm:$0xff] %vm1421_vm7, %v1332_v31 }
 0x185   : > { %1373 = vrot.lane.b32.xlu1 %v2847_v53, %s2585_s22 }
 0x186   : > { %1341 = vrot.lane.b32.xlu0 %v1269_v14, %s2585_s22 }
 0x187   : > { %v1555_v13 = vpop.permute.xlu1 %1554  ;;  %v1523_v3 = vpop.permute.xlu0 %1522 }
 0x188   : > { %1633 = vst.msk [vmem:[#allocation2 + $0x90] sm:$0xff] %vm1614_vm8, %v1555_v13  ;;  %1617 = vst.msk [vmem:[#allocation2 + $0x10] sm:$0xff] %vm1614_vm8, %v1523_v3 }
 0x189   : > { %1375 = vrot.lane.b32.xlu1 %v2844_v52, %s2585_s22 }
 0x18a   : > { %1343 = vrot.lane.b32.xlu0 %v1270_v0, %s2585_s22 }
 0x18b   : > { %v980_v2 = vpop.permute.xlu1 %979  ;;  %v948_v53 = vpop.permute.xlu0 %947 }
 0x18c   : > { %1056 = vst.msk [vmem:[#allocation2 + $0xa0] sm:$0xff] %vm1035_vm5, %v980_v2  ;;  %1040 = vst.msk [vmem:[#allocation2 + $0x20] sm:$0xff] %vm1035_vm5, %v948_v53 }
 0x18d   : > { %1566 = vrot.lane.b32.xlu1 %v1478_v45, %s2586_s23 }
 0x18e   : > { %1534 = vrot.lane.b32.xlu0 %v1462_v25, %s2586_s23 }
 0x18f   : > { %v1557_v32 = vpop.permute.xlu1 %1556  ;;  %v1525_v52 = vpop.permute.xlu0 %1524 }
 0x190   : > { %1634 = vst.msk [vmem:[#allocation2 + $0x98] sm:$0xff] %vm1614_vm8, %v1557_v32  ;;  %1618 = vst.msk [vmem:[#allocation2 + $0x18] sm:$0xff] %vm1614_vm8, %v1525_v52  ;;  %v1290_v32 = vld [vmem:[%s2627_s16 + $0x108] sm:$0xff] }
 0x191   : > { %991 = vrot.lane.b32.xlu1 %v1478_v45, %s2583_s20  ;;  %v1289_v45 = vld [vmem:[%s2627_s16 + $0x100] sm:$0xff]  ;;  %v1274_v52 = vld [vmem:[%s2627_s16 + $0x88] sm:$0xff] }
 0x192   : > { %959 = vrot.lane.b32.xlu0 %v1462_v25, %s2583_s20  ;;  %v1273_v25 = vld [vmem:[%s2627_s16 + $0x80] sm:$0xff] }
 0x193   : > { %v1748_v33 = vpop.permute.xlu1 %1747  ;;  %v1716_v42 = vpop.permute.xlu0 %1715 }
 0x194   : > { %1826 = vst.msk [vmem:[#allocation2 + $0x90] sm:$0xff] %vm1807_vm9, %v1748_v33  ;;  %1810 = vst.msk [vmem:[#allocation2 + $0x10] sm:$0xff] %vm1807_vm9, %v1716_v42  ;;  %v1482_v33 = vld [vmem:[%s2627_s16 + $0x101] sm:$0xff] }
 0x195   : > { %1568 = vrot.lane.b32.xlu1 %v1479_v44, %s2586_s23  ;;  %v1466_v42 = vld [vmem:[%s2627_s16 + $0x81] sm:$0xff] }
 0x196   : > { %1536 = vrot.lane.b32.xlu0 %v1463_v24, %s2586_s23 }
 0x197   : > { %v982_v62 = vpop.permute.xlu1 %981  ;;  %v950_v8 = vpop.permute.xlu0 %949 }
 0x198   : > { %1057 = vst.msk [vmem:[#allocation2 + $0xa8] sm:$0xff] %vm1035_vm5, %v982_v62  ;;  %1041 = vst.msk [vmem:[#allocation2 + $0x28] sm:$0xff] %vm1035_vm5, %v950_v8 }
 0x199   : > { %1759 = vrot.lane.b32.xlu1 %v1671_v43, %s2587_s4 }
 0x19a   : > { %1727 = vrot.lane.b32.xlu0 %v1655_v9, %s2587_s4 }
 0x19b   : > { %v1173_v61 = vpop.permute.xlu1 %1172  ;;  %v1141_v20 = vpop.permute.xlu0 %1140  ;;  %v1842_v39 = vld [vmem:[#allocation2 + $0x10] sm:$0xff] }
 0x19c   : > { %v1858_v38 = vld [vmem:[#allocation2 + $0x90] sm:$0xff]  ;;  %1249 = vst.msk [vmem:[#allocation2 + $0xa0] sm:$0xff] %vm1228_vm6, %v1173_v61  ;;  %1233 = vst.msk [vmem:[#allocation2 + $0x20] sm:$0xff] %vm1228_vm6, %v1141_v20  ;;  %2464 = vmatprep.mubr.msk.f32.mxu0 %vm1877_vm10, %v1842_v39 }
 0x19d   : > { %2488 = vmatprep.mubr.msk.f32.mxu1 %vm1877_vm10, %v1858_v38  ;;  %993 = vrot.lane.b32.xlu1 %v1479_v44, %s2583_s20  ;;  %v1483_v61 = vld [vmem:[%s2627_s16 + $0x109] sm:$0xff] }
 0x19e   : > { %961 = vrot.lane.b32.xlu0 %v1463_v24, %s2583_s20  ;;  %v1467_v20 = vld [vmem:[%s2627_s16 + $0x89] sm:$0xff] }
 0x19f   : > { %v1750_v19 = vpop.permute.xlu1 %1749  ;;  %v1718_v34 = vpop.permute.xlu0 %1717 }
 0x1a0   : > { %1827 = vst.msk [vmem:[#allocation2 + $0x98] sm:$0xff] %vm1807_vm9, %v1750_v19  ;;  %1811 = vst.msk [vmem:[#allocation2 + $0x18] sm:$0xff] %vm1807_vm9, %v1718_v34  ;;  %v1675_v19 = vld [vmem:[%s2627_s16 + $0x102] sm:$0xff] }
 0x1a1   : > { %1184 = vrot.lane.b32.xlu1 %v1671_v43, %s2584_s21  ;;  %v1659_v34 = vld [vmem:[%s2627_s16 + $0x82] sm:$0xff] }
 0x1a2   : > { %1152 = vrot.lane.b32.xlu0 %v1655_v9, %s2584_s21 }
 0x1a3   : > { %v1175_v36 = vpop.permute.xlu1 %1174  ;;  %v1143_v37 = vpop.permute.xlu0 %1142 }
 0x1a4   : > { %1250 = vst.msk [vmem:[#allocation2 + $0xa8] sm:$0xff] %vm1228_vm6, %v1175_v36  ;;  %1234 = vst.msk [vmem:[#allocation2 + $0x28] sm:$0xff] %vm1228_vm6, %v1143_v37 }
 0x1a5   : > { %1761 = vrot.lane.b32.xlu1 %v1672_v5, %s2587_s4 }
 0x1a6   : > { %1729 = vrot.lane.b32.xlu0 %v1656_v35, %s2587_s4 }
 0x1a7   : > { %v1366_v4 = vpop.permute.xlu1 %1365  ;;  %v1334_v47 = vpop.permute.xlu0 %1333  ;;  %v1843_v21 = vld [vmem:[#allocation2 + $0x18] sm:$0xff] }
 0x1a8   : > { %v1859_v30 = vld [vmem:[#allocation2 + $0x98] sm:$0xff]  ;;  %1442 = vst.msk [vmem:[#allocation2 + $0xa0] sm:$0xff] %vm1421_vm7, %v1366_v4  ;;  %1426 = vst.msk [vmem:[#allocation2 + $0x20] sm:$0xff] %vm1421_vm7, %v1334_v47  ;;  %2465 = vmatmul.mubr.msk.f32.gmra.mrb[2].mxu0 %vm1877_vm10, %v1843_v21 }
 0x1a9   : > { %2489 = vmatmul.mubr.msk.f32.gmra.mrb[2].mxu1 %vm1877_vm10, %v1859_v30  ;;  %1186 = vrot.lane.b32.xlu1 %v1672_v5, %s2584_s21 }
 0x1aa   : > { %1154 = vrot.lane.b32.xlu0 %v1656_v35, %s2584_s21 }
 0x1ab   : > { %v1368_v46 = vpop.permute.xlu1 %1367  ;;  %v1336_v49 = vpop.permute.xlu0 %1335 }
 0x1ac   : > { %1443 = vst.msk [vmem:[#allocation2 + $0xa8] sm:$0xff] %vm1421_vm7, %v1368_v46  ;;  %1427 = vst.msk [vmem:[#allocation2 + $0x28] sm:$0xff] %vm1421_vm7, %v1336_v49 }
 0x1ad   : > { %1377 = vrot.lane.b32.xlu1 %v1287_v12, %s2585_s22  ;;  %v1676_v12 = vld [vmem:[%s2627_s16 + $0x10a] sm:$0xff] }
 0x1ae   : > { %1345 = vrot.lane.b32.xlu0 %v1271_v16, %s2585_s22  ;;  %v1660_v16 = vld [vmem:[%s2627_s16 + $0x8a] sm:$0xff] }
 0x1af   : > { %v1559_v27 = vpop.permute.xlu1 %1558  ;;  %v1527_v48 = vpop.permute.xlu0 %1526 }
 0x1b0   : > { %1635 = vst.msk [vmem:[#allocation2 + $0xa0] sm:$0xff] %vm1614_vm8, %v1559_v27  ;;  %1619 = vst.msk [vmem:[#allocation2 + $0x20] sm:$0xff] %vm1614_vm8, %v1527_v48 }
 0x1b1   : > { %1379 = vrot.lane.b32.xlu1 %v1288_v59, %s2585_s22 }
 0x1b2   : > { %1347 = vrot.lane.b32.xlu0 %v1272_v60, %s2585_s22 }
 0x1b3   : > { %v984_v11 = vpop.permute.xlu1 %983  ;;  %v952_v1 = vpop.permute.xlu0 %951 }
 0x1b4   : > { %1058 = vst.msk [vmem:[#allocation2 + $0xb0] sm:$0xff] %vm1035_vm5, %v984_v11  ;;  %1042 = vst.msk [vmem:[#allocation2 + $0x30] sm:$0xff] %vm1035_vm5, %v952_v1 }
 0x1b5   : > { %1570 = vrot.lane.b32.xlu1 %v1480_v26, %s2586_s23 }
 0x1b6   : > { %1538 = vrot.lane.b32.xlu0 %v1464_v54, %s2586_s23 }
 0x1b7   : > { %v1561_v58 = vpop.permute.xlu1 %1560  ;;  %v1529_v29 = vpop.permute.xlu0 %1528 }
 0x1b8   : > { %1636 = vst.msk [vmem:[#allocation2 + $0xa8] sm:$0xff] %vm1614_vm8, %v1561_v58  ;;  %1620 = vst.msk [vmem:[#allocation2 + $0x28] sm:$0xff] %vm1614_vm8, %v1529_v29  ;;  %v1292_v58 = vld [vmem:[%s2627_s16 + $0x118] sm:$0xff] }
 0x1b9   : > { %995 = vrot.lane.b32.xlu1 %v1480_v26, %s2583_s20  ;;  %v1291_v26 = vld [vmem:[%s2627_s16 + $0x110] sm:$0xff]  ;;  %v1276_v29 = vld [vmem:[%s2627_s16 + $0x98] sm:$0xff] }
 0x1ba   : > { %963 = vrot.lane.b32.xlu0 %v1464_v54, %s2583_s20  ;;  %v1275_v54 = vld [vmem:[%s2627_s16 + $0x90] sm:$0xff] }
 0x1bb   : > { %v1752_v23 = vpop.permute.xlu1 %1751  ;;  %v1720_v41 = vpop.permute.xlu0 %1719 }
 0x1bc   : > { %1828 = vst.msk [vmem:[#allocation2 + $0xa0] sm:$0xff] %vm1807_vm9, %v1752_v23  ;;  %1812 = vst.msk [vmem:[#allocation2 + $0x20] sm:$0xff] %vm1807_vm9, %v1720_v41  ;;  %v1484_v23 = vld [vmem:[%s2627_s16 + $0x111] sm:$0xff] }
 0x1bd   : > { %1572 = vrot.lane.b32.xlu1 %v1481_v10, %s2586_s23  ;;  %v1468_v41 = vld [vmem:[%s2627_s16 + $0x91] sm:$0xff] }
 0x1be   : > { %1540 = vrot.lane.b32.xlu0 %v1465_v63, %s2586_s23 }
 0x1bf   : > { %v986_v18 = vpop.permute.xlu1 %985  ;;  %v954_v55 = vpop.permute.xlu0 %953 }
 0x1c0   : > { %1059 = vst.msk [vmem:[#allocation2 + $0xb8] sm:$0xff] %vm1035_vm5, %v986_v18  ;;  %1043 = vst.msk [vmem:[#allocation2 + $0x38] sm:$0xff] %vm1035_vm5, %v954_v55  ;;  %v1485_v18 = vld [vmem:[%s2627_s16 + $0x119] sm:$0xff] }
 0x1c1   : > { %1763 = vrot.lane.b32.xlu1 %v1673_v22, %s2587_s4  ;;  %v1469_v55 = vld [vmem:[%s2627_s16 + $0x99] sm:$0xff] }
 0x1c2   : > { %1731 = vrot.lane.b32.xlu0 %v1657_v40, %s2587_s4 }
 0x1c3   : > { %v1177_v7 = vpop.permute.xlu1 %1176  ;;  %v1145_v51 = vpop.permute.xlu0 %1144  ;;  %v1844_v17 = vld [vmem:[#allocation2 + $0x20] sm:$0xff] }
 0x1c4   : > { %v1860_v56 = vld [vmem:[#allocation2 + $0xa0] sm:$0xff]  ;;  %1251 = vst.msk [vmem:[#allocation2 + $0xb0] sm:$0xff] %vm1228_vm6, %v1177_v7  ;;  %1235 = vst.msk [vmem:[#allocation2 + $0x30] sm:$0xff] %vm1228_vm6, %v1145_v51  ;;  %2467 = vmatprep.mubr.msk.f32.mxu0 %vm1877_vm10, %v1844_v17  ;;  %v1677_v17 = vld [vmem:[%s2627_s16 + $0x112] sm:$0xff] }
 0x1c5   : > { %2491 = vmatprep.mubr.msk.f32.mxu1 %vm1877_vm10, %v1860_v56  ;;  %997 = vrot.lane.b32.xlu1 %v1481_v10, %s2583_s20  ;;  %v1661_v56 = vld [vmem:[%s2627_s16 + $0x92] sm:$0xff] }
 0x1c6   : > { %965 = vrot.lane.b32.xlu0 %v1465_v63, %s2583_s20 }
 0x1c7   : > { %v1754_v57 = vpop.permute.xlu1 %1753  ;;  %v1722_v28 = vpop.permute.xlu0 %1721 }
 0x1c8   : > { %1829 = vst.msk [vmem:[#allocation2 + $0xa8] sm:$0xff] %vm1807_vm9, %v1754_v57  ;;  %1813 = vst.msk [vmem:[#allocation2 + $0x28] sm:$0xff] %vm1807_vm9, %v1722_v28 }
 0x1c9   : > { %1188 = vrot.lane.b32.xlu1 %v1673_v22, %s2584_s21 }
 0x1ca   : > { %1156 = vrot.lane.b32.xlu0 %v1657_v40, %s2584_s21 }
 0x1cb   : > { %v1179_v14 = vpop.permute.xlu1 %1178  ;;  %v1147_v15 = vpop.permute.xlu0 %1146 }
 0x1cc   : > { %1252 = vst.msk [vmem:[#allocation2 + $0xb8] sm:$0xff] %vm1228_vm6, %v1179_v14  ;;  %1236 = vst.msk [vmem:[#allocation2 + $0x38] sm:$0xff] %vm1228_vm6, %v1147_v15 }
 0x1cd   : > { %1765 = vrot.lane.b32.xlu1 %v1674_v6, %s2587_s4 }
 0x1ce   : > { %1733 = vrot.lane.b32.xlu0 %v1658_v50, %s2587_s4 }
 0x1cf   : > { %v1370_v31 = vpop.permute.xlu1 %1369  ;;  %v1338_v0 = vpop.permute.xlu0 %1337  ;;  %v1845_v13 = vld [vmem:[#allocation2 + $0x28] sm:$0xff] }
 0x1d0   : > { %v1861_v3 = vld [vmem:[#allocation2 + $0xa8] sm:$0xff]  ;;  %1444 = vst.msk [vmem:[#allocation2 + $0xb0] sm:$0xff] %vm1421_vm7, %v1370_v31  ;;  %1428 = vst.msk [vmem:[#allocation2 + $0x30] sm:$0xff] %vm1421_vm7, %v1338_v0  ;;  %2468 = vmatmul.mubr.msk.f32.gmra.mrb[4].mxu0 %vm1877_vm10, %v1845_v13 }
 0x1d1   : > { %2492 = vmatmul.mubr.msk.f32.gmra.mrb[4].mxu1 %vm1877_vm10, %v1861_v3  ;;  %1190 = vrot.lane.b32.xlu1 %v1674_v6, %s2584_s21  ;;  %v1678_v6 = vld [vmem:[%s2627_s16 + $0x11a] sm:$0xff] }
 0x1d2   : > { %1158 = vrot.lane.b32.xlu0 %v1658_v50, %s2584_s21  ;;  %v1662_v50 = vld [vmem:[%s2627_s16 + $0x9a] sm:$0xff] }
 0x1d3   : > { %v1372_v2 = vpop.permute.xlu1 %1371  ;;  %v1340_v53 = vpop.permute.xlu0 %1339 }
 0x1d4   : > { %1445 = vst.msk [vmem:[#allocation2 + $0xb8] sm:$0xff] %vm1421_vm7, %v1372_v2  ;;  %1429 = vst.msk [vmem:[#allocation2 + $0x38] sm:$0xff] %vm1421_vm7, %v1340_v53 }
 0x1d5   : > { %1381 = vrot.lane.b32.xlu1 %v1289_v45, %s2585_s22 }
 0x1d6   : > { %1349 = vrot.lane.b32.xlu0 %v1273_v25, %s2585_s22 }
 0x1d7   : > { %v1563_v44 = vpop.permute.xlu1 %1562  ;;  %v1531_v24 = vpop.permute.xlu0 %1530 }
 0x1d8   : > { %1637 = vst.msk [vmem:[#allocation2 + $0xb0] sm:$0xff] %vm1614_vm8, %v1563_v44  ;;  %1621 = vst.msk [vmem:[#allocation2 + $0x30] sm:$0xff] %vm1614_vm8, %v1531_v24 }
 0x1d9   : > { %1383 = vrot.lane.b32.xlu1 %v1290_v32, %s2585_s22 }
 0x1da   : > { %1351 = vrot.lane.b32.xlu0 %v1274_v52, %s2585_s22 }
 0x1db   : > { %v988_v43 = vpop.permute.xlu1 %987  ;;  %v956_v9 = vpop.permute.xlu0 %955 }
 0x1dc   : > { %1060 = vst.msk [vmem:[#allocation2 + $0xc0] sm:$0xff] %vm1035_vm5, %v988_v43  ;;  %1044 = vst.msk [vmem:[#allocation2 + $0x40] sm:$0xff] %vm1035_vm5, %v956_v9 }
 0x1dd   : > { %1574 = vrot.lane.b32.xlu1 %v1482_v33, %s2586_s23 }
 0x1de   : > { %1542 = vrot.lane.b32.xlu0 %v1466_v42, %s2586_s23 }
 0x1df   : > { %v1565_v62 = vpop.permute.xlu1 %1564  ;;  %v1533_v8 = vpop.permute.xlu0 %1532 }
 0x1e0   : > { %1638 = vst.msk [vmem:[#allocation2 + $0xb8] sm:$0xff] %vm1614_vm8, %v1565_v62  ;;  %1622 = vst.msk [vmem:[#allocation2 + $0x38] sm:$0xff] %vm1614_vm8, %v1533_v8 }
 0x1e1   : > { %999 = vrot.lane.b32.xlu1 %v1482_v33, %s2583_s20 }
 0x1e2   : > { %967 = vrot.lane.b32.xlu0 %v1466_v42, %s2583_s20 }
 0x1e3   : > { %v1756_v39 = vpop.permute.xlu1 %1755  ;;  %v1724_v38 = vpop.permute.xlu0 %1723 }
 0x1e4   : > { %1830 = vst.msk [vmem:[#allocation2 + $0xb0] sm:$0xff] %vm1807_vm9, %v1756_v39  ;;  %1814 = vst.msk [vmem:[#allocation2 + $0x30] sm:$0xff] %vm1807_vm9, %v1724_v38 }
 0x1e5   : > { %1576 = vrot.lane.b32.xlu1 %v1483_v61, %s2586_s23 }
 0x1e6   : > { %1544 = vrot.lane.b32.xlu0 %v1467_v20, %s2586_s23 }
 0x1e7   : > { %v990_v5 = vpop.permute.xlu1 %989  ;;  %v958_v35 = vpop.permute.xlu0 %957 }
 0x1e8   : > { %1061 = vst.msk [vmem:[#allocation2 + $0xc8] sm:$0xff] %vm1035_vm5, %v990_v5  ;;  %1045 = vst.msk [vmem:[#allocation2 + $0x48] sm:$0xff] %vm1035_vm5, %v958_v35 }
 0x1e9   : > { %1767 = vrot.lane.b32.xlu1 %v1675_v19, %s2587_s4 }
 0x1ea   : > { %1735 = vrot.lane.b32.xlu0 %v1659_v34, %s2587_s4 }
 0x1eb   : > { %v1181_v36 = vpop.permute.xlu1 %1180  ;;  %v1846_v4 = vld [vmem:[#allocation2 + $0x30] sm:$0xff] }
 0x1ec   : > { %v1149_v37 = vpop.permute.xlu0 %1148  ;;  %v1862_v47 = vld [vmem:[#allocation2 + $0xb0] sm:$0xff]  ;;  %1253 = vst.msk [vmem:[#allocation2 + $0xc0] sm:$0xff] %vm1228_vm6, %v1181_v36  ;;  %2470 = vmatprep.mubr.msk.f32.mxu0 %vm1877_vm10, %v1846_v4 }
 0x1ed   : > { %1237 = vst.msk [vmem:[#allocation2 + $0x40] sm:$0xff] %vm1228_vm6, %v1149_v37  ;;  %2494 = vmatprep.mubr.msk.f32.mxu1 %vm1877_vm10, %v1862_v47  ;;  %1001 = vrot.lane.b32.xlu1 %v1483_v61, %s2583_s20 }
 0x1ee   : > { %969 = vrot.lane.b32.xlu0 %v1467_v20, %s2583_s20 }
 0x1ef   : > { %v1758_v21 = vpop.permute.xlu1 %1757 }
 0x1f0   : > { %v1726_v30 = vpop.permute.xlu0 %1725  ;;  %1831 = vst.msk [vmem:[#allocation2 + $0xb8] sm:$0xff] %vm1807_vm9, %v1758_v21 }
 0x1f1   : > { %1815 = vst.msk [vmem:[#allocation2 + $0x38] sm:$0xff] %vm1807_vm9, %v1726_v30  ;;  %1192 = vrot.lane.b32.xlu1 %v1675_v19, %s2584_s21 }
 0x1f2   : > { %1160 = vrot.lane.b32.xlu0 %v1659_v34, %s2584_s21 }
 0x1f3   : > { %v1183_v46 = vpop.permute.xlu1 %1182 }
 0x1f4   : > { %v1151_v49 = vpop.permute.xlu0 %1150  ;;  %1254 = vst.msk [vmem:[#allocation2 + $0xc8] sm:$0xff] %vm1228_vm6, %v1183_v46 }
 0x1f5   : > { %1238 = vst.msk [vmem:[#allocation2 + $0x48] sm:$0xff] %vm1228_vm6, %v1151_v49  ;;  %1769 = vrot.lane.b32.xlu1 %v1676_v12, %s2587_s4 }
 0x1f6   : > { %1737 = vrot.lane.b32.xlu0 %v1660_v16, %s2587_s4 }
 0x1f7   : > { %v1374_v59 = vpop.permute.xlu1 %1373  ;;  %v1863_v48 = vld [vmem:[#allocation2 + $0xb8] sm:$0xff] }
 0x1f8   : > { %v1342_v60 = vpop.permute.xlu0 %1341  ;;  %v1847_v27 = vld [vmem:[#allocation2 + $0x38] sm:$0xff]  ;;  %1446 = vst.msk [vmem:[#allocation2 + $0xc0] sm:$0xff] %vm1421_vm7, %v1374_v59  ;;  %2495 = vmatmul.mubr.msk.f32.gmra.mrb[6].mxu1 %vm1877_vm10, %v1863_v48 }
 0x1f9   : > { %1430 = vst.msk [vmem:[#allocation2 + $0x40] sm:$0xff] %vm1421_vm7, %v1342_v60  ;;  %2471 = vmatmul.mubr.msk.f32.gmra.mrb[6].mxu0 %vm1877_vm10, %v1847_v27  ;;  %1194 = vrot.lane.b32.xlu1 %v1676_v12, %s2584_s21 }
 0x1fa   : > { %1162 = vrot.lane.b32.xlu0 %v1660_v16, %s2584_s21 }
 0x1fb   : > { %v1376_v11 = vpop.permute.xlu1 %1375 }
 0x1fc   : > { %v1344_v1 = vpop.permute.xlu0 %1343  ;;  %1447 = vst.msk [vmem:[#allocation2 + $0xc8] sm:$0xff] %vm1421_vm7, %v1376_v11 }
 0x1fd   : > { %1431 = vst.msk [vmem:[#allocation2 + $0x48] sm:$0xff] %vm1421_vm7, %v1344_v1  ;;  %1385 = vrot.lane.b32.xlu1 %v1291_v26, %s2585_s22 }
 0x1fe   : > { %1353 = vrot.lane.b32.xlu0 %v1275_v54, %s2585_s22 }
 0x1ff   : > { %v1567_v10 = vpop.permute.xlu1 %1566 }
 0x200   : > { %v1535_v63 = vpop.permute.xlu0 %1534  ;;  %1639 = vst.msk [vmem:[#allocation2 + $0xc0] sm:$0xff] %vm1614_vm8, %v1567_v10 }
 0x201   : > { %1623 = vst.msk [vmem:[#allocation2 + $0x40] sm:$0xff] %vm1614_vm8, %v1535_v63  ;;  %1387 = vrot.lane.b32.xlu1 %v1292_v58, %s2585_s22 }
 0x202   : > { %1355 = vrot.lane.b32.xlu0 %v1276_v29, %s2585_s22 }
 0x203   : > { %v992_v22 = vpop.permute.xlu1 %991 }
 0x204   : > { %v960_v40 = vpop.permute.xlu0 %959  ;;  %1062 = vst.msk [vmem:[#allocation2 + $0xd0] sm:$0xff] %vm1035_vm5, %v992_v22 }
 0x205   : > { %1046 = vst.msk [vmem:[#allocation2 + $0x50] sm:$0xff] %vm1035_vm5, %v960_v40  ;;  %1578 = vrot.lane.b32.xlu1 %v1484_v23, %s2586_s23 }
 0x206   : > { %1546 = vrot.lane.b32.xlu0 %v1468_v41, %s2586_s23 }
 0x207   : > { %v1569_v7 = vpop.permute.xlu1 %1568 }
 0x208   : > { %v1537_v51 = vpop.permute.xlu0 %1536  ;;  %1640 = vst.msk [vmem:[#allocation2 + $0xc8] sm:$0xff] %vm1614_vm8, %v1569_v7 }
 0x209   : > { %1624 = vst.msk [vmem:[#allocation2 + $0x48] sm:$0xff] %vm1614_vm8, %v1537_v51  ;;  %1580 = vrot.lane.b32.xlu1 %v1485_v18, %s2586_s23 }
 0x20a   : > { %1548 = vrot.lane.b32.xlu0 %v1469_v55, %s2586_s23 }
 0x20b   : > { %v1760_v57 = vpop.permute.xlu1 %1759 }
 0x20c   : > { %v1728_v28 = vpop.permute.xlu0 %1727  ;;  %1832 = vst.msk [vmem:[#allocation2 + $0xc0] sm:$0xff] %vm1807_vm9, %v1760_v57 }
 0x20d   : > { %1816 = vst.msk [vmem:[#allocation2 + $0x40] sm:$0xff] %vm1807_vm9, %v1728_v28  ;;  %1771 = vrot.lane.b32.xlu1 %v1677_v17, %s2587_s4 }
 0x20e   : > { %1739 = vrot.lane.b32.xlu0 %v1661_v56, %s2587_s4 }
 0x20f   : > { %v994_v14 = vpop.permute.xlu1 %993 }
 0x210   : > { %v962_v15 = vpop.permute.xlu0 %961  ;;  %1063 = vst.msk [vmem:[#allocation2 + $0xd8] sm:$0xff] %vm1035_vm5, %v994_v14 }
 0x211   : > { %1047 = vst.msk [vmem:[#allocation2 + $0x58] sm:$0xff] %vm1035_vm5, %v962_v15  ;;  %1773 = vrot.lane.b32.xlu1 %v1678_v6, %s2587_s4 }
 0x212   : > { %1741 = vrot.lane.b32.xlu0 %v1662_v50, %s2587_s4 }
 0x213   : > { %v1185_v31 = vpop.permute.xlu1 %1184  ;;  %v1864_v3 = vld [vmem:[#allocation2 + $0xc0] sm:$0xff] }
 0x214   : > { %v1153_v0 = vpop.permute.xlu0 %1152  ;;  %v1848_v13 = vld [vmem:[#allocation2 + $0x40] sm:$0xff]  ;;  %1255 = vst.msk [vmem:[#allocation2 + $0xd0] sm:$0xff] %vm1228_vm6, %v1185_v31  ;;  %2497 = vmatprep.mubr.msk.f32.mxu1 %vm1877_vm10, %v1864_v3 }
 0x215   : > { %1239 = vst.msk [vmem:[#allocation2 + $0x50] sm:$0xff] %vm1228_vm6, %v1153_v0  ;;  %2473 = vmatprep.mubr.msk.f32.mxu0 %vm1877_vm10, %v1848_v13 }
 0x217   : > { %v1762_v45 = vpop.permute.xlu1 %1761 }
 0x218   : > { %v1730_v25 = vpop.permute.xlu0 %1729  ;;  %1833 = vst.msk [vmem:[#allocation2 + $0xc8] sm:$0xff] %vm1807_vm9, %v1762_v45 }
 0x219   : > { %1817 = vst.msk [vmem:[#allocation2 + $0x48] sm:$0xff] %vm1807_vm9, %v1730_v25 }
 0x21b   : > { %v1187_v2 = vpop.permute.xlu1 %1186 }
 0x21c   : > { %v1155_v53 = vpop.permute.xlu0 %1154  ;;  %1256 = vst.msk [vmem:[#allocation2 + $0xd8] sm:$0xff] %vm1228_vm6, %v1187_v2 }
 0x21d   : > { %1240 = vst.msk [vmem:[#allocation2 + $0x58] sm:$0xff] %vm1228_vm6, %v1155_v53 }
 0x21f   : > { %v1378_v32 = vpop.permute.xlu1 %1377  ;;  %v1865_v24 = vld [vmem:[#allocation2 + $0xc8] sm:$0xff] }
 0x220   : > { %v1346_v52 = vpop.permute.xlu0 %1345  ;;  %v1849_v44 = vld [vmem:[#allocation2 + $0x48] sm:$0xff]  ;;  %1448 = vst.msk [vmem:[#allocation2 + $0xd0] sm:$0xff] %vm1421_vm7, %v1378_v32  ;;  %2498 = vmatmul.mubr.msk.f32.gmra.mrb[8].mxu1 %vm1877_vm10, %v1865_v24 }
 0x221   : > { %1432 = vst.msk [vmem:[#allocation2 + $0x50] sm:$0xff] %vm1421_vm7, %v1346_v52  ;;  %2474 = vmatmul.mubr.msk.f32.gmra.mrb[8].mxu0 %vm1877_vm10, %v1849_v44 }
 0x223   : > { %v1380_v33 = vpop.permute.xlu1 %1379 }
 0x224   : > { %v1348_v42 = vpop.permute.xlu0 %1347  ;;  %1449 = vst.msk [vmem:[#allocation2 + $0xd8] sm:$0xff] %vm1421_vm7, %v1380_v33 }
 0x225   : > { %1433 = vst.msk [vmem:[#allocation2 + $0x58] sm:$0xff] %vm1421_vm7, %v1348_v42 }
 0x227   : > { %v1571_v43 = vpop.permute.xlu1 %1570 }
 0x228   : > { %v1539_v9 = vpop.permute.xlu0 %1538  ;;  %1641 = vst.msk [vmem:[#allocation2 + $0xd0] sm:$0xff] %vm1614_vm8, %v1571_v43 }
 0x229   : > { %1625 = vst.msk [vmem:[#allocation2 + $0x50] sm:$0xff] %vm1614_vm8, %v1539_v9 }
 0x22b   : > { %v996_v62 = vpop.permute.xlu1 %995 }
 0x22c   : > { %v964_v8 = vpop.permute.xlu0 %963  ;;  %1064 = vst.msk [vmem:[#allocation2 + $0xe0] sm:$0xff] %vm1035_vm5, %v996_v62 }
 0x22d   : > { %1048 = vst.msk [vmem:[#allocation2 + $0x60] sm:$0xff] %vm1035_vm5, %v964_v8 }
 0x22f   : > { %v1573_v61 = vpop.permute.xlu1 %1572 }
 0x230   : > { %v1541_v20 = vpop.permute.xlu0 %1540  ;;  %1642 = vst.msk [vmem:[#allocation2 + $0xd8] sm:$0xff] %vm1614_vm8, %v1573_v61 }
 0x231   : > { %1626 = vst.msk [vmem:[#allocation2 + $0x58] sm:$0xff] %vm1614_vm8, %v1541_v20 }
 0x233   : > { %v1764_v39 = vpop.permute.xlu1 %1763 }
 0x234   : > { %v1732_v38 = vpop.permute.xlu0 %1731  ;;  %1834 = vst.msk [vmem:[#allocation2 + $0xd0] sm:$0xff] %vm1807_vm9, %v1764_v39 }
 0x235   : > { %1818 = vst.msk [vmem:[#allocation2 + $0x50] sm:$0xff] %vm1807_vm9, %v1732_v38 }
 0x237   : > { %v998_v19 = vpop.permute.xlu1 %997 }
 0x238   : > { %v966_v34 = vpop.permute.xlu0 %965  ;;  %1065 = vst.msk [vmem:[#allocation2 + $0xe8] sm:$0xff] %vm1035_vm5, %v998_v19 }
 0x239   : > { %1049 = vst.msk [vmem:[#allocation2 + $0x68] sm:$0xff] %vm1035_vm5, %v966_v34 }
 0x23b   : > { %v1189_v5 = vpop.permute.xlu1 %1188  ;;  %v1866_v37 = vld [vmem:[#allocation2 + $0xd0] sm:$0xff] }
 0x23c   : > { %v1157_v35 = vpop.permute.xlu0 %1156  ;;  %v1850_v36 = vld [vmem:[#allocation2 + $0x50] sm:$0xff]  ;;  %1257 = vst.msk [vmem:[#allocation2 + $0xe0] sm:$0xff] %vm1228_vm6, %v1189_v5  ;;  %2500 = vmatprep.mubr.msk.f32.mxu1 %vm1877_vm10, %v1866_v37 }
 0x23d   : > { %1241 = vst.msk [vmem:[#allocation2 + $0x60] sm:$0xff] %vm1228_vm6, %v1157_v35  ;;  %2476 = vmatprep.mubr.msk.f32.mxu0 %vm1877_vm10, %v1850_v36 }
 0x23f   : > { %v1766_v4 = vpop.permute.xlu1 %1765 }
 0x240   : > { %v1734_v47 = vpop.permute.xlu0 %1733  ;;  %1835 = vst.msk [vmem:[#allocation2 + $0xd8] sm:$0xff] %vm1807_vm9, %v1766_v4 }
 0x241   : > { %1819 = vst.msk [vmem:[#allocation2 + $0x58] sm:$0xff] %vm1807_vm9, %v1734_v47 }
 0x243   : > { %v1191_v21 = vpop.permute.xlu1 %1190 }
 0x244   : > { %v1159_v30 = vpop.permute.xlu0 %1158  ;;  %1258 = vst.msk [vmem:[#allocation2 + $0xe8] sm:$0xff] %vm1228_vm6, %v1191_v21 }
 0x245   : > { %1242 = vst.msk [vmem:[#allocation2 + $0x68] sm:$0xff] %vm1228_vm6, %v1159_v30 }
 0x247   : > { %v1382_v12 = vpop.permute.xlu1 %1381  ;;  %v1867_v49 = vld [vmem:[#allocation2 + $0xd8] sm:$0xff] }
 0x248   : > { %v1350_v16 = vpop.permute.xlu0 %1349  ;;  %v1851_v46 = vld [vmem:[#allocation2 + $0x58] sm:$0xff]  ;;  %1450 = vst.msk [vmem:[#allocation2 + $0xe0] sm:$0xff] %vm1421_vm7, %v1382_v12  ;;  %2501 = vmatmul.mubr.msk.f32.gmra.mrb[10].mxu1 %vm1877_vm10, %v1867_v49 }
 0x249   : > { %1434 = vst.msk [vmem:[#allocation2 + $0x60] sm:$0xff] %vm1421_vm7, %v1350_v16  ;;  %2477 = vmatmul.mubr.msk.f32.gmra.mrb[10].mxu0 %vm1877_vm10, %v1851_v46 }
 0x24b   : > { %v1384_v59 = vpop.permute.xlu1 %1383 }
 0x24c   : > { %v1352_v60 = vpop.permute.xlu0 %1351  ;;  %1451 = vst.msk [vmem:[#allocation2 + $0xe8] sm:$0xff] %vm1421_vm7, %v1384_v59 }
 0x24d   : > { %1435 = vst.msk [vmem:[#allocation2 + $0x68] sm:$0xff] %vm1421_vm7, %v1352_v60 }
 0x24f   : > { %v1575_v27 = vpop.permute.xlu1 %1574 }
 0x250   : > { %v1543_v48 = vpop.permute.xlu0 %1542  ;;  %1643 = vst.msk [vmem:[#allocation2 + $0xe0] sm:$0xff] %vm1614_vm8, %v1575_v27 }
 0x251   : > { %1627 = vst.msk [vmem:[#allocation2 + $0x60] sm:$0xff] %vm1614_vm8, %v1543_v48 }
 0x253   : > { %v1000_v26 = vpop.permute.xlu1 %999  ;;  %v2463_v11 = vpop.f32.mrb[0].mxu0 }
 0x254   : > { %v968_v54 = vpop.permute.xlu0 %967  ;;  %1066 = vst.msk [vmem:[#allocation2 + $0xf0] sm:$0xff] %vm1035_vm5, %v1000_v26  ;;  %v2487_v1 = vpop.f32.mrb[0].mxu1 }
 0x255   : > { %1050 = vst.msk [vmem:[#allocation2 + $0x70] sm:$0xff] %vm1035_vm5, %v968_v54  ;;  %v2044_v58 = vpop.f32.mrb[1].mxu0  ;;  %v2124_v29 = vpop.f32.mrb[1].mxu1 }
 0x256   : > { %2205 = vst.msk [vmem:[%s3616_s14 + $0x8] sm:$0xff] %vm2203_vm11, %v2463_v11  ;;  %2221 = vst.msk [vmem:[%s3616_s14 + $0x88] sm:$0xff] %vm2203_vm11, %v2487_v1 }
 0x257   : > { %2204 = vst.msk [vmem:[%s3616_s14] sm:$0xff] %vm2203_vm11, %v2044_v58  ;;  %2220 = vst.msk [vmem:[%s3616_s14 + $0x80] sm:$0xff] %vm2203_vm11, %v2124_v29  ;;  %v1577_v10 = vpop.permute.xlu1 %1576 }
 0x258   : > { %v1545_v63 = vpop.permute.xlu0 %1544  ;;  %1644 = vst.msk [vmem:[#allocation2 + $0xe8] sm:$0xff] %vm1614_vm8, %v1577_v10 }
 0x259   : > { %1628 = vst.msk [vmem:[#allocation2 + $0x68] sm:$0xff] %vm1614_vm8, %v1545_v63 }
 0x25b   : > { %v1768_v23 = vpop.permute.xlu1 %1767 }
 0x25c   : > { %v1736_v41 = vpop.permute.xlu0 %1735  ;;  %1836 = vst.msk [vmem:[#allocation2 + $0xe0] sm:$0xff] %vm1807_vm9, %v1768_v23 }
 0x25d   : > { %1820 = vst.msk [vmem:[#allocation2 + $0x60] sm:$0xff] %vm1807_vm9, %v1736_v41 }
 0x25f   : > { %v1002_v22 = vpop.permute.xlu1 %1001 }
 0x260   : > { %v970_v40 = vpop.permute.xlu0 %969  ;;  %1067 = vst.msk [vmem:[#allocation2 + $0xf8] sm:$0xff] %vm1035_vm5, %v1002_v22 }
 0x261   : > { %1051 = vst.msk [vmem:[#allocation2 + $0x78] sm:$0xff] %vm1035_vm5, %v970_v40 }
 0x263   : > { %v1193_v18 = vpop.permute.xlu1 %1192  ;;  %v1868_v51 = vld [vmem:[#allocation2 + $0xe0] sm:$0xff] }
 0x264   : > { %v1161_v55 = vpop.permute.xlu0 %1160  ;;  %v1852_v7 = vld [vmem:[#allocation2 + $0x60] sm:$0xff]  ;;  %1259 = vst.msk [vmem:[#allocation2 + $0xf0] sm:$0xff] %vm1228_vm6, %v1193_v18  ;;  %2503 = vmatprep.mubr.msk.f32.mxu1 %vm1877_vm10, %v1868_v51 }
 0x265   : > { %1243 = vst.msk [vmem:[#allocation2 + $0x70] sm:$0xff] %vm1228_vm6, %v1161_v55  ;;  %2479 = vmatprep.mubr.msk.f32.mxu0 %vm1877_vm10, %v1852_v7 }
 0x267   : > { %v1770_v17 = vpop.permute.xlu1 %1769 }
 0x268   : > { %v1738_v56 = vpop.permute.xlu0 %1737  ;;  %1837 = vst.msk [vmem:[#allocation2 + $0xe8] sm:$0xff] %vm1807_vm9, %v1770_v17 }
 0x269   : > { %1821 = vst.msk [vmem:[#allocation2 + $0x68] sm:$0xff] %vm1807_vm9, %v1738_v56 }
 0x26b   : > { %v1195_v57 = vpop.permute.xlu1 %1194 }
 0x26c   : > { %v1163_v28 = vpop.permute.xlu0 %1162  ;;  %1260 = vst.msk [vmem:[#allocation2 + $0xf8] sm:$0xff] %vm1228_vm6, %v1195_v57 }
 0x26d   : > { %1244 = vst.msk [vmem:[#allocation2 + $0x78] sm:$0xff] %vm1228_vm6, %v1163_v28 }
 0x26f   : > { %v1386_v6 = vpop.permute.xlu1 %1385  ;;  %v1869_v15 = vld [vmem:[#allocation2 + $0xe8] sm:$0xff] }
 0x270   : > { %v1354_v50 = vpop.permute.xlu0 %1353  ;;  %v1853_v14 = vld [vmem:[#allocation2 + $0x68] sm:$0xff]  ;;  %1452 = vst.msk [vmem:[#allocation2 + $0xf0] sm:$0xff] %vm1421_vm7, %v1386_v6  ;;  %2504 = vmatmul.mubr.msk.f32.gmra.mrb[12].mxu1 %vm1877_vm10, %v1869_v15 }
 0x271   : > { %1436 = vst.msk [vmem:[#allocation2 + $0x70] sm:$0xff] %vm1421_vm7, %v1354_v50  ;;  %2480 = vmatmul.mubr.msk.f32.gmra.mrb[12].mxu0 %vm1877_vm10, %v1853_v14 }
 0x273   : > { %v1388_v31 = vpop.permute.xlu1 %1387 }
 0x274   : > { %v1356_v0 = vpop.permute.xlu0 %1355  ;;  %1453 = vst.msk [vmem:[#allocation2 + $0xf8] sm:$0xff] %vm1421_vm7, %v1388_v31 }
 0x275   : > { %1437 = vst.msk [vmem:[#allocation2 + $0x78] sm:$0xff] %vm1421_vm7, %v1356_v0 }
 0x277   : > { %v1579_v13 = vpop.permute.xlu1 %1578 }
 0x278   : > { %v1547_v3 = vpop.permute.xlu0 %1546  ;;  %1645 = vst.msk [vmem:[#allocation2 + $0xf0] sm:$0xff] %vm1614_vm8, %v1579_v13 }
 0x279   : > { %1629 = vst.msk [vmem:[#allocation2 + $0x70] sm:$0xff] %vm1614_vm8, %v1547_v3 }
 0x27b   : > { %v1581_v45 = vpop.permute.xlu1 %1580  ;;  %v2466_v2 = vpop.f32.mrb[2].mxu0 }
 0x27c   : > { %v1549_v25 = vpop.permute.xlu0 %1548  ;;  %1646 = vst.msk [vmem:[#allocation2 + $0xf8] sm:$0xff] %vm1614_vm8, %v1581_v45  ;;  %v2490_v53 = vpop.f32.mrb[2].mxu1 }
 0x27d   : > { %1630 = vst.msk [vmem:[#allocation2 + $0x78] sm:$0xff] %vm1614_vm8, %v1549_v25  ;;  %v2054_v32 = vpop.f32.mrb[3].mxu0  ;;  %v2134_v52 = vpop.f32.mrb[3].mxu1 }
 0x27e   : > { %2207 = vst.msk [vmem:[%s3616_s14 + $0x18] sm:$0xff] %vm2203_vm11, %v2466_v2  ;;  %2223 = vst.msk [vmem:[%s3616_s14 + $0x98] sm:$0xff] %vm2203_vm11, %v2490_v53 }
 0x27f   : > { %2206 = vst.msk [vmem:[%s3616_s14 + $0x10] sm:$0xff] %vm2203_vm11, %v2054_v32  ;;  %2222 = vst.msk [vmem:[%s3616_s14 + $0x90] sm:$0xff] %vm2203_vm11, %v2134_v52  ;;  %v1772_v44 = vpop.permute.xlu1 %1771 }
 0x280   : > { %v1740_v24 = vpop.permute.xlu0 %1739  ;;  %1838 = vst.msk [vmem:[#allocation2 + $0xf0] sm:$0xff] %vm1807_vm9, %v1772_v44 }
 0x281   : > { %1822 = vst.msk [vmem:[#allocation2 + $0x70] sm:$0xff] %vm1807_vm9, %v1740_v24 }
 0x283   : > { %v1774_v33 = vpop.permute.xlu1 %1773 }
 0x284   : > { %v1742_v42 = vpop.permute.xlu0 %1741  ;;  %1839 = vst.msk [vmem:[#allocation2 + $0xf8] sm:$0xff] %vm1807_vm9, %v1774_v33 }
 0x285   : > { %1823 = vst.msk [vmem:[#allocation2 + $0x78] sm:$0xff] %vm1807_vm9, %v1742_v42 }
 0x287   : > { %v1870_v9 = vld [vmem:[#allocation2 + $0xf0] sm:$0xff] }
 0x288   : > { %v1854_v43 = vld [vmem:[#allocation2 + $0x70] sm:$0xff]  ;;  %2506 = vmatprep.mubr.msk.f32.mxu1 %vm1877_vm10, %v1870_v9 }
 0x289   : > { %2482 = vmatprep.mubr.msk.f32.mxu0 %vm1877_vm10, %v1854_v43 }
 0x28b   : > { %v1871_v8 = vld [vmem:[#allocation2 + $0xf8] sm:$0xff] }
 0x28c   : > { %v1855_v62 = vld [vmem:[#allocation2 + $0x78] sm:$0xff]  ;;  %2507 = vmatmul.mubr.msk.f32.gmra.mrb[14].mxu1 %vm1877_vm10, %v1871_v8 }
 0x28d   : > { %2483 = vmatmul.mubr.msk.f32.gmra.mrb[14].mxu0 %vm1877_vm10, %v1855_v62 }
 0x2a3   : > { %v2469_v61 = vpop.f32.mrb[4].mxu0 }
 0x2a4   : > { %v2493_v20 = vpop.f32.mrb[4].mxu1  ;;  %2209 = vst.msk [vmem:[%s3616_s14 + $0x28] sm:$0xff] %vm2203_vm11, %v2469_v61  ;;  %v2064_v39 = vpop.f32.mrb[5].mxu0 }
 0x2a5   : > { %2225 = vst.msk [vmem:[%s3616_s14 + $0xa8] sm:$0xff] %vm2203_vm11, %v2493_v20  ;;  %v2144_v38 = vpop.f32.mrb[5].mxu1  ;;  %2208 = vst.msk [vmem:[%s3616_s14 + $0x20] sm:$0xff] %vm2203_vm11, %v2064_v39 }
 0x2a6   : > { %2224 = vst.msk [vmem:[%s3616_s14 + $0xa0] sm:$0xff] %vm2203_vm11, %v2144_v38 }
 0x2cb   : > { %v2496_v34 = vpop.f32.mrb[6].mxu1 }
 0x2cc   : > { %v2472_v19 = vpop.f32.mrb[6].mxu0  ;;  %2227 = vst.msk [vmem:[%s3616_s14 + $0xb8] sm:$0xff] %vm2203_vm11, %v2496_v34  ;;  %v2154_v35 = vpop.f32.mrb[7].mxu1 }
 0x2cd   : > { %2211 = vst.msk [vmem:[%s3616_s14 + $0x38] sm:$0xff] %vm2203_vm11, %v2472_v19  ;;  %v2074_v5 = vpop.f32.mrb[7].mxu0  ;;  %2226 = vst.msk [vmem:[%s3616_s14 + $0xb0] sm:$0xff] %vm2203_vm11, %v2154_v35 }
 0x2ce   : > { %2210 = vst.msk [vmem:[%s3616_s14 + $0x30] sm:$0xff] %vm2203_vm11, %v2074_v5 }
 0x2f3   : > { %v2499_v37 = vpop.f32.mrb[8].mxu1 }
 0x2f4   : > { %v2475_v36 = vpop.f32.mrb[8].mxu0  ;;  %2229 = vst.msk [vmem:[%s3616_s14 + $0xc8] sm:$0xff] %vm2203_vm11, %v2499_v37  ;;  %v2164_v47 = vpop.f32.mrb[9].mxu1 }
 0x2f5   : > { %2213 = vst.msk [vmem:[%s3616_s14 + $0x48] sm:$0xff] %vm2203_vm11, %v2475_v36  ;;  %v2084_v4 = vpop.f32.mrb[9].mxu0  ;;  %2228 = vst.msk [vmem:[%s3616_s14 + $0xc0] sm:$0xff] %vm2203_vm11, %v2164_v47 }
 0x2f6   : > { %2212 = vst.msk [vmem:[%s3616_s14 + $0x40] sm:$0xff] %vm2203_vm11, %v2084_v4 }
 0x31b   : > { %v2502_v30 = vpop.f32.mrb[10].mxu1 }
 0x31c   : > { %v2478_v21 = vpop.f32.mrb[10].mxu0  ;;  %2231 = vst.msk [vmem:[%s3616_s14 + $0xd8] sm:$0xff] %vm2203_vm11, %v2502_v30  ;;  %v2174_v16 = vpop.f32.mrb[11].mxu1 }
 0x31d   : > { %2215 = vst.msk [vmem:[%s3616_s14 + $0x58] sm:$0xff] %vm2203_vm11, %v2478_v21  ;;  %v2094_v12 = vpop.f32.mrb[11].mxu0  ;;  %2230 = vst.msk [vmem:[%s3616_s14 + $0xd0] sm:$0xff] %vm2203_vm11, %v2174_v16 }
 0x31e   : > { %2214 = vst.msk [vmem:[%s3616_s14 + $0x50] sm:$0xff] %vm2203_vm11, %v2094_v12 }
 0x343   : > { %v2505_v49 = vpop.f32.mrb[12].mxu1 }
 0x344   : > { %v2481_v46 = vpop.f32.mrb[12].mxu0  ;;  %2233 = vst.msk [vmem:[%s3616_s14 + $0xe8] sm:$0xff] %vm2203_vm11, %v2505_v49  ;;  %v2184_v60 = vpop.f32.mrb[13].mxu1 }
 0x345   : > { %2217 = vst.msk [vmem:[%s3616_s14 + $0x68] sm:$0xff] %vm2203_vm11, %v2481_v46  ;;  %v2104_v59 = vpop.f32.mrb[13].mxu0  ;;  %2232 = vst.msk [vmem:[%s3616_s14 + $0xe0] sm:$0xff] %vm2203_vm11, %v2184_v60 }
 0x346   : > { %2216 = vst.msk [vmem:[%s3616_s14 + $0x60] sm:$0xff] %vm2203_vm11, %v2104_v59 }
 0x35f   : > { %v2508_v48 = vpop.f32.mrb[14].mxu1 }
 0x360   : > { %v2484_v27 = vpop.f32.mrb[14].mxu0  ;;  %2235 = vst.msk [vmem:[%s3616_s14 + $0xf8] sm:$0xff] %vm2203_vm11, %v2508_v48  ;;  %v2194_v54 = vpop.f32.mrb[15].mxu1 }
 0x361   : > { %2219 = vst.msk [vmem:[%s3616_s14 + $0x78] sm:$0xff] %vm2203_vm11, %v2484_v27  ;;  %v2114_v26 = vpop.f32.mrb[15].mxu0  ;;  %2234 = vst.msk [vmem:[%s3616_s14 + $0xf0] sm:$0xff] %vm2203_vm11, %v2194_v54 }
 0x362   : > { %2218 = vst.msk [vmem:[%s3616_s14 + $0x70] sm:$0xff] %vm2203_vm11, %v2114_v26 }
 0x363 PF: > { %s12_s11 = sadd.s32 1, %s2578_s11   ;;  %s3742_s9 = smov %s2574_s10 }
 0x364   : > { %p9_p5 = scmp.ge.s32.totalorder %s12_s11, 4   ;;  %s3743_s10 = smov %s3745_s12 }
 0x366   :  { %11 = sbr.rel (!%p9_p5) target bundleno = 2 (0x2), region = 61 }

</bundles_post_ra>
